<compile_context>
chip_gen: v7x
topology: tpu7x:2x2x1
jax: 0.10.0
libtpu: 0.0.40
codegen_flags: <defaults>
</compile_context>

<pallas_src>
import jax
import jax.numpy as jnp
from jax.experimental import pallas as pl
from jax.experimental.pallas import tpu as pltpu

K_IN = 784         # true flattened input width (no HBM-side padding)
N_OUT = 64         # true fc5 out-features
N_OUT_PAD = 128    # lane-dense padded output width (sliced back in wrapper)


def mlp_kernel(x_ref,
               w1_ref, b1_ref,
               w2_ref, b2_ref,
               w3_ref, b3_ref,
               w4_ref, b4_ref,
               w5_ref, b5_ref,
               out_ref):
    """Fused 5-layer MLP on one (TB, 784) bf16 batch tile.

    Weights bf16, MXU accumulates in f32, bias-add / ReLU in f32 (VPU-safe on
    v5e), inter-layer activations stored as bf16 to keep VMEM temps small.
    """

    def dense(h_bf16, w_ref, b_ref, relu):
        y = jnp.dot(h_bf16, w_ref[...], preferred_element_type=jnp.float32)
        y = y + b_ref[...]                        # f32 bias add
        if relu:
            return jnp.maximum(y, 0.0).astype(jnp.bfloat16)
        return y                                  # final layer stays f32

    h = x_ref[...]                       # (TB, 784) bf16
    h = dense(h, w1_ref, b1_ref, True)   # fc1 -> ReLU  (TB, 512) bf16
    # dropout(0.2): identity at inference.
    # TODO(synk): training-mode stochastic dropout (pltpu.prng_*) not implemented.
    h = dense(h, w2_ref, b2_ref, True)   # fc2 -> ReLU  (TB, 512) bf16
    h = dense(h, w3_ref, b3_ref, True)   # fc3 -> ReLU  (TB, 256) bf16
    h = dense(h, w4_ref, b4_ref, True)   # fc4 -> ReLU  (TB, 128) bf16
    h = dense(h, w5_ref, b5_ref, False)  # fc5 (no activation), padded to 128 cols
    out_ref[...] = h                     # (TB, 128) f32 lane-dense store


def init_params(key):
    """PyTorch Linear default init (uniform +/- 1/sqrt(fan_in)), weights stored
    transposed (in, out).  Last layer's out-features padded 64 -> 128 with
    zeros (sliced off in the wrapper).  Weights bf16, biases f32."""
    dims = [(784, 512), (512, 512), (512, 256), (256, 128), (128, 64)]
    params = []
    for li, (fan_in, fan_out) in enumerate(dims):
        key, kw, kb = jax.random.split(key, 3)
        bound = 1.0 / jnp.sqrt(float(fan_in))
        w = jax.random.uniform(kw, (fan_in, fan_out), jnp.float32, -bound, bound)
        b = jax.random.uniform(kb, (1, fan_out), jnp.float32, -bound, bound)
        if li == len(dims) - 1:
            w = jnp.pad(w, ((0, 0), (0, N_OUT_PAD - fan_out)))   # zero out-features
            b = jnp.pad(b, ((0, 0), (0, N_OUT_PAD - fan_out)))
        params.append((w.astype(jnp.bfloat16), b))
    return params


def _pick_batch_tile(B):
    """Sublane-aligned batch tile.  v5e caps at 128 (4x128^2 MXU); otherwise up
    to 512 to amortize per-step overhead, and sized so B > 8 gives >= 2 grid
    steps (keeps both v7x TensorCores busy)."""
    try:
        kind = jax.devices()[0].device_kind.lower()
    except Exception:
        kind = ""
    tb_cap = 128 if ("v5" in kind and "v5p" not in kind) else 512
    if B <= 8:
        return 8
    half = -(-B // 2)                       # ~half the batch -> >= 2 grid steps
    tb = -(-half // 8) * 8                  # round up to sublane multiple
    return max(8, min(tb_cap, tb))


def net_forward(x, params):
    B = x.shape[0]
    # == x.view(B, -1); bf16 halves x HBM traffic (kernel matmul is bf16 anyway).
    x2 = x.reshape(B, -1).astype(jnp.bfloat16)          # (B, 784) bf16

    TB = _pick_batch_tile(B)
    B_pad = -(-B // TB) * TB
    if B_pad != B:
        x2 = jnp.pad(x2, ((0, B_pad - B), (0, 0)))

    flat = []
    for w, b in params:
        flat.extend([w, b])

    # x / out: tiled over the batch grid.  Weights & biases: constant index map
    # -> DMA'd once, stay VMEM resident across all grid steps.
    x_spec = pl.BlockSpec((TB, K_IN), lambda i: (i, 0))
    param_specs = [pl.BlockSpec(a.shape, lambda i: (0, 0)) for a in flat]
    out_spec = pl.BlockSpec((TB, N_OUT_PAD), lambda i: (i, 0))

    # Advisory cost estimate for XLA's scheduler around the custom call.
    macs_per_row = sum(int(w.shape[0]) * int(w.shape[1]) for w, _ in params)
    flops = 2 * B_pad * macs_per_row
    bytes_accessed = (
        x2.size * x2.dtype.itemsize
        + sum(int(a.size) * a.dtype.itemsize for a in flat)
        + B_pad * N_OUT_PAD * 4
    )

    out = pl.pallas_call(
        mlp_kernel,
        out_shape=jax.ShapeDtypeStruct((B_pad, N_OUT_PAD), jnp.float32),
        grid=(B_pad // TB,),
        in_specs=[x_spec] + param_specs,
        out_specs=out_spec,
        compiler_params=pltpu.CompilerParams(
            dimension_semantics=("parallel",),       # batch tiles shard across v7x TCs
            vmem_limit_bytes=32 * 1024 * 1024,       # headroom above v5e 16 MiB default
        ),
        cost_estimate=pl.CostEstimate(
            flops=flops, transcendentals=0, bytes_accessed=bytes_accessed),
    )(x2, *flat)

    return out[:B, :N_OUT]                           # strip batch + lane padding


if __name__ == "__main__":
    key = jax.random.PRNGKey(0)
    k_x, k_p = jax.random.split(key)

    # Fashion-MNIST style input: NCHW (batch=2, 1 channel, 28x28).
    x = jax.random.normal(k_x, (2, 1, 28, 28), dtype=jnp.float32)
    params = init_params(k_p)

    out = net_forward(x, params)
    out = jax.block_until_ready(out)
    assert out.shape == (2, 64) and out.dtype == jnp.float32
    print("KERNEL_OK")
</pallas_src>

<mosaic_0001>
module attributes {stable_mosaic.version = 11 : i64} {
  func.func @mlp_kernel(%arg0: i32, %arg1: memref<8x784xbf16, #tpu.memory_space<vmem>>, %arg2: memref<784x512xbf16, #tpu.memory_space<vmem>>, %arg3: memref<1x512xf32, #tpu.memory_space<vmem>>, %arg4: memref<512x512xbf16, #tpu.memory_space<vmem>>, %arg5: memref<1x512xf32, #tpu.memory_space<vmem>>, %arg6: memref<512x256xbf16, #tpu.memory_space<vmem>>, %arg7: memref<1x256xf32, #tpu.memory_space<vmem>>, %arg8: memref<256x128xbf16, #tpu.memory_space<vmem>>, %arg9: memref<1x128xf32, #tpu.memory_space<vmem>>, %arg10: memref<128x128xbf16, #tpu.memory_space<vmem>>, %arg11: memref<1x128xf32, #tpu.memory_space<vmem>>, %arg12: memref<8x128xf32, #tpu.memory_space<vmem>>) attributes {dimension_semantics = [#tpu.dimension_semantics<parallel>], iteration_bounds = array<i64: 1>, scalar_prefetch = 0 : i64, scratch_operands = 0 : i64, tpu.core_type = #tpu.core_type<tc>, window_params = [{transform_indices = @transform_0, window_bounds = array<i64: 8, 784>}, {pipeline_mode = #tpu.pipeline_mode<synchronous>, transform_indices = @transform_1, window_bounds = array<i64: 784, 512>}, {pipeline_mode = #tpu.pipeline_mode<synchronous>, transform_indices = @transform_2, window_bounds = array<i64: 1, 512>}, {pipeline_mode = #tpu.pipeline_mode<synchronous>, transform_indices = @transform_3, window_bounds = array<i64: 512, 512>}, {pipeline_mode = #tpu.pipeline_mode<synchronous>, transform_indices = @transform_4, window_bounds = array<i64: 1, 512>}, {pipeline_mode = #tpu.pipeline_mode<synchronous>, transform_indices = @transform_5, window_bounds = array<i64: 512, 256>}, {pipeline_mode = #tpu.pipeline_mode<synchronous>, transform_indices = @transform_6, window_bounds = array<i64: 1, 256>}, {pipeline_mode = #tpu.pipeline_mode<synchronous>, transform_indices = @transform_7, window_bounds = array<i64: 256, 128>}, {pipeline_mode = #tpu.pipeline_mode<synchronous>, transform_indices = @transform_8, window_bounds = array<i64: 1, 128>}, {pipeline_mode = #tpu.pipeline_mode<synchronous>, transform_indices = @transform_9, window_bounds = array<i64: 128, 128>}, {pipeline_mode = #tpu.pipeline_mode<synchronous>, transform_indices = @transform_10, window_bounds = array<i64: 1, 128>}, {transform_indices = @transform_11, window_bounds = array<i64: 8, 128>}]} {
    %c0 = arith.constant 0 : index
    %c0_0 = arith.constant 0 : index
    %0 = vector.load %arg1[%c0, %c0_0] : memref<8x784xbf16, #tpu.memory_space<vmem>>, vector<8x784xbf16>
    %c0_1 = arith.constant 0 : index
    %c0_2 = arith.constant 0 : index
    %1 = vector.load %arg2[%c0_1, %c0_2] : memref<784x512xbf16, #tpu.memory_space<vmem>>, vector<784x512xbf16>
    %cst = arith.constant dense<0.000000e+00> : vector<8x512xf32>
    %2 = tpu.matmul %0, %1, %cst {dimension_numbers = #tpu.dot_dimension_numbers<[1], [0], [0], [1], [0, 0, 1, 1], [], []>} : vector<8x784xbf16>, vector<784x512xbf16>, vector<8x512xf32> -> vector<8x512xf32>
    %c0_3 = arith.constant 0 : index
    %c0_4 = arith.constant 0 : index
    %3 = vector.load %arg3[%c0_3, %c0_4] : memref<1x512xf32, #tpu.memory_space<vmem>>, vector<1x512xf32>
    %4 = vector.broadcast %3 : vector<1x512xf32> to vector<8x512xf32>
    %5 = arith.addf %2, %4 : vector<8x512xf32>
    %cst_5 = arith.constant 0.000000e+00 : f32
    %6 = vector.broadcast %cst_5 : f32 to vector<8x512xf32>
    %7 = arith.maximumf %5, %6 : vector<8x512xf32>
    %8 = arith.truncf %7 : vector<8x512xf32> to vector<8x512xbf16>
    %c0_6 = arith.constant 0 : index
    %c0_7 = arith.constant 0 : index
    %9 = vector.load %arg4[%c0_6, %c0_7] : memref<512x512xbf16, #tpu.memory_space<vmem>>, vector<512x512xbf16>
    %cst_8 = arith.constant dense<0.000000e+00> : vector<8x512xf32>
    %10 = tpu.matmul %8, %9, %cst_8 {dimension_numbers = #tpu.dot_dimension_numbers<[1], [0], [0], [1], [0, 0, 1, 1], [], []>} : vector<8x512xbf16>, vector<512x512xbf16>, vector<8x512xf32> -> vector<8x512xf32>
    %c0_9 = arith.constant 0 : index
    %c0_10 = arith.constant 0 : index
    %11 = vector.load %arg5[%c0_9, %c0_10] : memref<1x512xf32, #tpu.memory_space<vmem>>, vector<1x512xf32>
    %12 = vector.broadcast %11 : vector<1x512xf32> to vector<8x512xf32>
    %13 = arith.addf %10, %12 : vector<8x512xf32>
    %cst_11 = arith.constant 0.000000e+00 : f32
    %14 = vector.broadcast %cst_11 : f32 to vector<8x512xf32>
    %15 = arith.maximumf %13, %14 : vector<8x512xf32>
    %16 = arith.truncf %15 : vector<8x512xf32> to vector<8x512xbf16>
    %c0_12 = arith.constant 0 : index
    %c0_13 = arith.constant 0 : index
    %17 = vector.load %arg6[%c0_12, %c0_13] : memref<512x256xbf16, #tpu.memory_space<vmem>>, vector<512x256xbf16>
    %cst_14 = arith.constant dense<0.000000e+00> : vector<8x256xf32>
    %18 = tpu.matmul %16, %17, %cst_14 {dimension_numbers = #tpu.dot_dimension_numbers<[1], [0], [0], [1], [0, 0, 1, 1], [], []>} : vector<8x512xbf16>, vector<512x256xbf16>, vector<8x256xf32> -> vector<8x256xf32>
    %c0_15 = arith.constant 0 : index
    %c0_16 = arith.constant 0 : index
    %19 = vector.load %arg7[%c0_15, %c0_16] : memref<1x256xf32, #tpu.memory_space<vmem>>, vector<1x256xf32>
    %20 = vector.broadcast %19 : vector<1x256xf32> to vector<8x256xf32>
    %21 = arith.addf %18, %20 : vector<8x256xf32>
    %cst_17 = arith.constant 0.000000e+00 : f32
    %22 = vector.broadcast %cst_17 : f32 to vector<8x256xf32>
    %23 = arith.maximumf %21, %22 : vector<8x256xf32>
    %24 = arith.truncf %23 : vector<8x256xf32> to vector<8x256xbf16>
    %c0_18 = arith.constant 0 : index
    %c0_19 = arith.constant 0 : index
    %25 = vector.load %arg8[%c0_18, %c0_19] : memref<256x128xbf16, #tpu.memory_space<vmem>>, vector<256x128xbf16>
    %cst_20 = arith.constant dense<0.000000e+00> : vector<8x128xf32>
    %26 = tpu.matmul %24, %25, %cst_20 {dimension_numbers = #tpu.dot_dimension_numbers<[1], [0], [0], [1], [0, 0, 1, 1], [], []>} : vector<8x256xbf16>, vector<256x128xbf16>, vector<8x128xf32> -> vector<8x128xf32>
    %c0_21 = arith.constant 0 : index
    %c0_22 = arith.constant 0 : index
    %27 = vector.load %arg9[%c0_21, %c0_22] : memref<1x128xf32, #tpu.memory_space<vmem>>, vector<1x128xf32>
    %28 = vector.broadcast %27 : vector<1x128xf32> to vector<8x128xf32>
    %29 = arith.addf %26, %28 : vector<8x128xf32>
    %cst_23 = arith.constant 0.000000e+00 : f32
    %30 = vector.broadcast %cst_23 : f32 to vector<8x128xf32>
    %31 = arith.maximumf %29, %30 : vector<8x128xf32>
    %32 = arith.truncf %31 : vector<8x128xf32> to vector<8x128xbf16>
    %c0_24 = arith.constant 0 : index
    %c0_25 = arith.constant 0 : index
    %33 = vector.load %arg10[%c0_24, %c0_25] : memref<128x128xbf16, #tpu.memory_space<vmem>>, vector<128x128xbf16>
    %cst_26 = arith.constant dense<0.000000e+00> : vector<8x128xf32>
    %34 = tpu.matmul %32, %33, %cst_26 {dimension_numbers = #tpu.dot_dimension_numbers<[1], [0], [0], [1], [0, 0, 1, 1], [], []>} : vector<8x128xbf16>, vector<128x128xbf16>, vector<8x128xf32> -> vector<8x128xf32>
    %c0_27 = arith.constant 0 : index
    %c0_28 = arith.constant 0 : index
    %35 = vector.load %arg11[%c0_27, %c0_28] : memref<1x128xf32, #tpu.memory_space<vmem>>, vector<1x128xf32>
    %36 = vector.broadcast %35 : vector<1x128xf32> to vector<8x128xf32>
    %37 = arith.addf %34, %36 : vector<8x128xf32>
    %c0_29 = arith.constant 0 : index
    %c0_30 = arith.constant 0 : index
    %38 = vector.load %arg12[%c0_29, %c0_30] : memref<8x128xf32, #tpu.memory_space<vmem>>, vector<8x128xf32>
    tpu.vector_store %arg12[%c0_29, %c0_30], %37 {strides = array<i32>} : memref<8x128xf32, #tpu.memory_space<vmem>>, vector<8x128xf32>,
    return
  }
  func.func @transform_0(%arg0: i32) -> (i32, i32) {
    %c0_i32 = arith.constant 0 : i32
    %c0_i32_0 = arith.constant 0 : i32
    return %arg0, %c0_i32 : i32, i32
  }
  func.func @transform_1(%arg0: i32) -> (i32, i32) {
    %c0_i32 = arith.constant 0 : i32
    %c0_i32_0 = arith.constant 0 : i32
    %c0_i32_1 = arith.constant 0 : i32
    return %c0_i32, %c0_i32_0 : i32, i32
  }
  func.func @transform_2(%arg0: i32) -> (i32, i32) {
    %c0_i32 = arith.constant 0 : i32
    %c0_i32_0 = arith.constant 0 : i32
    %c0_i32_1 = arith.constant 0 : i32
    return %c0_i32, %c0_i32_0 : i32, i32
  }
  func.func @transform_3(%arg0: i32) -> (i32, i32) {
    %c0_i32 = arith.constant 0 : i32
    %c0_i32_0 = arith.constant 0 : i32
    %c0_i32_1 = arith.constant 0 : i32
    return %c0_i32, %c0_i32_0 : i32, i32
  }
  func.func @transform_4(%arg0: i32) -> (i32, i32) {
    %c0_i32 = arith.constant 0 : i32
    %c0_i32_0 = arith.constant 0 : i32
    %c0_i32_1 = arith.constant 0 : i32
    return %c0_i32, %c0_i32_0 : i32, i32
  }
  func.func @transform_5(%arg0: i32) -> (i32, i32) {
    %c0_i32 = arith.constant 0 : i32
    %c0_i32_0 = arith.constant 0 : i32
    %c0_i32_1 = arith.constant 0 : i32
    return %c0_i32, %c0_i32_0 : i32, i32
  }
  func.func @transform_6(%arg0: i32) -> (i32, i32) {
    %c0_i32 = arith.constant 0 : i32
    %c0_i32_0 = arith.constant 0 : i32
    %c0_i32_1 = arith.constant 0 : i32
    return %c0_i32, %c0_i32_0 : i32, i32
  }
  func.func @transform_7(%arg0: i32) -> (i32, i32) {
    %c0_i32 = arith.constant 0 : i32
    %c0_i32_0 = arith.constant 0 : i32
    %c0_i32_1 = arith.constant 0 : i32
    return %c0_i32, %c0_i32_0 : i32, i32
  }
  func.func @transform_8(%arg0: i32) -> (i32, i32) {
    %c0_i32 = arith.constant 0 : i32
    %c0_i32_0 = arith.constant 0 : i32
    %c0_i32_1 = arith.constant 0 : i32
    return %c0_i32, %c0_i32_0 : i32, i32
  }
  func.func @transform_9(%arg0: i32) -> (i32, i32) {
    %c0_i32 = arith.constant 0 : i32
    %c0_i32_0 = arith.constant 0 : i32
    %c0_i32_1 = arith.constant 0 : i32
    return %c0_i32, %c0_i32_0 : i32, i32
  }
  func.func @transform_10(%arg0: i32) -> (i32, i32) {
    %c0_i32 = arith.constant 0 : i32
    %c0_i32_0 = arith.constant 0 : i32
    %c0_i32_1 = arith.constant 0 : i32
    return %c0_i32, %c0_i32_0 : i32, i32
  }
  func.func @transform_11(%arg0: i32) -> (i32, i32) {
    %c0_i32 = arith.constant 0 : i32
    %c0_i32_0 = arith.constant 0 : i32
    return %arg0, %c0_i32 : i32, i32
  }
}

</mosaic_0001>

<bundles_post_ra>
// kernel: tpu_custom_call.1
= control target key start
LH: loop header
LB: loop body
LE: loop exit
PB: predicated region body
PF: predicated region fallthrough
CT: control target
= control target key end

     0   :  { %16 = vsyncpa [#allocation3], 0  ;;  %s5001_s0 = inlined_call_operand.hbm [shape: bf16[8,784], index: 0, kind: input, shape index: {}]   ;;  %s5002_s1 = inlined_call_operand.hbm [shape: bf16[784,512], index: 1, kind: input, shape index: {}]   ;;  %s5003_s2 = inlined_call_operand.vmem [shape: f32[1,512], index: 2, kind: input, shape index: {}]   ;;  %s5004_s3 = inlined_call_operand.hbm [shape: bf16[512,512], index: 3, kind: input, shape index: {}]   ;;  %s5005_s4 = inlined_call_operand.vmem [shape: f32[1,512], index: 4, kind: input, shape index: {}]   ;;  %s5006_s5 = inlined_call_operand.hbm [shape: bf16[512,256], index: 5, kind: input, shape index: {}]   ;;  %s5007_s6 = inlined_call_operand.vmem [shape: f32[1,256], index: 6, kind: input, shape index: {}]   ;;  %s5008_s7 = inlined_call_operand.hbm [shape: bf16[256,128], index: 7, kind: input, shape index: {}]   ;;  %s5009_s8 = inlined_call_operand.vmem [shape: f32[1,128], index: 8, kind: input, shape index: {}]   ;;  %s5010_s9 = inlined_call_operand.hbm [shape: bf16[128,128], index: 9, kind: input, shape index: {}]   ;;  %s5011_s10 = inlined_call_operand.vmem [shape: f32[1,128], index: 10, kind: input, shape index: {}]   ;;  %s5012_s11 = inlined_call_operand.hbm [shape: f32[8,128], index: 11, kind: output, shape index: {}]  }
   0x1   :  { %17 = vsyncpa [#allocation6], 0 }
   0x2   :  { %18 = vsyncpa [#allocation9], 0 }
   0x3   :  { %19 = vsyncpa [#allocation12], 0 }
   0x4   :  { %20 = vsyncpa [#allocation4], 0  ;;  %s4749_s17 = smov [#allocation5]   ;;  %s4585_s21 = scalar_lea.hbm %s5002_s1, 25088 }
   0x5   :  { %s36_s18 = sshll.u32 %s4749_s17, 4  ;;  %p4586_p0 = scmp.ne.s32.totalorder %s5002_s1, %s4585_s21  ;;  %s37_s18 = int_to_ptr.vmem [resolvable:$true] %s36_s18 }
   0x6   :  { %p4589_p1 = scmp.lt.u32.totalorder %s4585_s21, %s5002_s1 }
   0x8   :  { %p4591_p2 = pnand %p4589_p1, %p4586_p0 }
   0xa   :  { %4594 = shalt.err (!%p4591_p2)
}
   0xb   :  { %s4595_s26 = scalar_lea.vmem %s37_s18, 25088  ;;  %p4600_p4 = scmp.lt.s32.totalorder %s37_s18, %s37_s18 }
   0xc   :  { %p4596_p3 = scmp.ne.s32.totalorder %s37_s18, %s4595_s26  ;;  %p4601_p5 = scmp.lt.s32.totalorder %s4595_s26, %s4595_s26 }
   0xe   :  { %p4602_p6 = por %p4601_p5, %p4600_p4 }
  0x10   :  { %p4603_p7 = pnand %p4602_p6, %p4596_p3 }
  0x12   :  { %4606 = shalt.err (!%p4603_p7)
}
  0x13   :  { %s4750_s27 = smov 256   ;;  %s4751_s28 = smov 16  }
  0x14   :  { %42 = dma.hbm_to_vmem [thread:$0]  %s5002_s1, 25088, %s37_s18, [#allocation6], %s4750_s27, %s4750_s27, %s4751_s28  }
  0x15   :  { %s4752_s12 = smov [#allocation8]   ;;  %s4607_s16 = scalar_lea.hbm %s5006_s5, 8192 }
  0x16   :  { %s64_s13 = sshll.u32 %s4752_s12, 4  ;;  %p4608_p8 = scmp.ne.s32.totalorder %s5006_s5, %s4607_s16  ;;  %s65_s13 = int_to_ptr.vmem [resolvable:$true] %s64_s13 }
  0x17   :  { %p4611_p9 = scmp.lt.u32.totalorder %s4607_s16, %s5006_s5 }
  0x19   :  { %p4613_p10 = pnand %p4611_p9, %p4608_p8 }
  0x1b   :  { %4616 = shalt.err (!%p4613_p10)
}
  0x1c   :  { %s4617_s22 = scalar_lea.vmem %s65_s13, 8192  ;;  %p4622_p12 = scmp.lt.s32.totalorder %s65_s13, %s65_s13 }
  0x1d   :  { %p4618_p11 = scmp.ne.s32.totalorder %s65_s13, %s4617_s22  ;;  %p4623_p13 = scmp.lt.s32.totalorder %s4617_s22, %s4617_s22 }
  0x1f   :  { %p4624_p0 = por %p4623_p13, %p4622_p12 }
  0x21   :  { %p4625_p1 = pnand %p4624_p0, %p4618_p11 }
  0x23   :  { %4628 = shalt.err (!%p4625_p1)
}
  0x24   :  { %s4753_s1 = smov 128   ;;  %s4754_s18 = smov 8  }
  0x25   :  { %70 = dma.hbm_to_vmem [thread:$0]  %s5006_s5, 8192, %s65_s13, [#allocation9], %s4753_s1, %s4753_s1, %s4754_s18  }
  0x26   :  { %s4755_s25 = smov [#allocation2]   ;;  %s4756_s29 = smov [#allocation7]  }
  0x27   :  { %s27_s26 = sshll.u32 %s4755_s25, 4  ;;  %s50_s30 = sshll.u32 %s4756_s29, 4  ;;  %s28_s26 = int_to_ptr.vmem [resolvable:$true] %s27_s26  ;;  %s4852_s30 = int_to_ptr.vmem [resolvable:$true] %s50_s30 }
  0x28   :  { %s4629_s15 = scalar_lea.hbm %s5001_s0, 448 }
  0x29   :  { %p4630_p2 = scmp.ne.s32.totalorder %s5001_s0, %s4629_s15  ;;  %p4633_p3 = scmp.lt.u32.totalorder %s4629_s15, %s5001_s0 }
  0x2b   :  { %p4635_p4 = pnand %p4633_p3, %p4630_p2 }
  0x2d   :  { %4638 = shalt.err (!%p4635_p4)
}
  0x2e   :  { %s4639_s5 = scalar_lea.vmem %s28_s26, 448  ;;  %p4644_p6 = scmp.lt.s32.totalorder %s28_s26, %s28_s26 }
  0x2f   :  { %p4640_p5 = scmp.ne.s32.totalorder %s28_s26, %s4639_s5  ;;  %p4645_p7 = scmp.lt.s32.totalorder %s4639_s5, %s4639_s5 }
  0x31   :  { %p4646_p8 = por %p4645_p7, %p4644_p6 }
  0x33   :  { %p4647_p9 = pnand %p4646_p8, %p4640_p5 }
  0x35   :  { %4650 = shalt.err (!%p4647_p9)
}
  0x36   :  { %30 = dma.hbm_to_vmem [thread:$0]  %s5001_s0, 448, %s28_s26, [#allocation3]  }
  0x37   :  { %s4651_s18 = scalar_lea.hbm %s5004_s3, 16384 }
  0x38   :  { %p4652_p10 = scmp.ne.s32.totalorder %s5004_s3, %s4651_s18  ;;  %p4655_p11 = scmp.lt.u32.totalorder %s4651_s18, %s5004_s3 }
  0x3a   :  { %p4657_p12 = pnand %p4655_p11, %p4652_p10 }
  0x3c   :  { %4660 = shalt.err (!%p4657_p12)
}
  0x3d   :  { %s4661_s12 = scalar_lea.vmem %s4852_s30, 16384  ;;  %p4666_p0 = scmp.lt.s32.totalorder %s4852_s30, %s4852_s30 }
  0x3e   :  { %p4662_p13 = scmp.ne.s32.totalorder %s4852_s30, %s4661_s12  ;;  %p4667_p1 = scmp.lt.s32.totalorder %s4661_s12, %s4661_s12 }
  0x40   :  { %p4668_p2 = por %p4667_p1, %p4666_p0 }
  0x42   :  { %p4669_p3 = pnand %p4668_p2, %p4662_p13 }
  0x44   :  { %4672 = shalt.err (!%p4669_p3)
}
  0x45   :  { %56 = dma.hbm_to_vmem [thread:$0]  %s5004_s3, 16384, %s4852_s30, [#allocation6], %s4750_s27, %s4750_s27, %s4751_s28  }
  0x46   :  { %s4757_s14 = smov [#allocation10]   ;;  %s4673_s19 = scalar_lea.hbm %s5008_s7, 2048 }
  0x47   :  { %s78_s15 = sshll.u32 %s4757_s14, 4  ;;  %p4674_p4 = scmp.ne.s32.totalorder %s5008_s7, %s4673_s19  ;;  %s79_s15 = int_to_ptr.vmem [resolvable:$true] %s78_s15 }
  0x48   :  { %p4677_p5 = scmp.lt.u32.totalorder %s4673_s19, %s5008_s7 }
  0x4a   :  { %p4679_p6 = pnand %p4677_p5, %p4674_p4 }
  0x4c   :  { %4682 = shalt.err (!%p4679_p6)
}
  0x4d   :  { %s4683_s22 = scalar_lea.vmem %s79_s15, 2048  ;;  %p4688_p8 = scmp.lt.s32.totalorder %s79_s15, %s79_s15 }
  0x4e   :  { %p4684_p7 = scmp.ne.s32.totalorder %s79_s15, %s4683_s22  ;;  %p4689_p9 = scmp.lt.s32.totalorder %s4683_s22, %s4683_s22 }
  0x50   :  { %p4690_p10 = por %p4689_p9, %p4688_p8 }
  0x52   :  { %p4691_p11 = pnand %p4690_p10, %p4684_p7 }
  0x54   :  { %4694 = shalt.err (!%p4691_p11)
}
  0x55   :  { %s4758_s3 = smov 64   ;;  %s4759_s27 = smov 4  }
  0x56   :  { %84 = dma.hbm_to_vmem [thread:$0]  %s5008_s7, 2048, %s79_s15, [#allocation9], %s4758_s3, %s4758_s3, %s4759_s27  }
  0x57   :  { %s4760_s1 = smov [#allocation11]   ;;  %s4695_s25 = scalar_lea.hbm %s5010_s9, 1024 }
  0x58   :  { %s92_s18 = sshll.u32 %s4760_s1, 4  ;;  %p4696_p12 = scmp.ne.s32.totalorder %s5010_s9, %s4695_s25  ;;  %s93_s18 = int_to_ptr.vmem [resolvable:$true] %s92_s18 }
  0x59   :  { %p4699_p13 = scmp.lt.u32.totalorder %s4695_s25, %s5010_s9 }
  0x5b   :  { %p4701_p0 = pnand %p4699_p13, %p4696_p12 }
  0x5d   :  { %4704 = shalt.err (!%p4701_p0)
}
  0x5e   :  { %s4705_s14 = scalar_lea.vmem %s93_s18, 1024  ;;  %p4710_p2 = scmp.lt.s32.totalorder %s93_s18, %s93_s18 }
  0x5f   :  { %p4706_p1 = scmp.ne.s32.totalorder %s93_s18, %s4705_s14  ;;  %p4711_p3 = scmp.lt.s32.totalorder %s4705_s14, %s4705_s14 }
  0x61   :  { %p4712_p4 = por %p4711_p3, %p4710_p2 }
  0x63   :  { %p4713_p5 = pnand %p4712_p4, %p4706_p1 }
  0x65   :  { %4716 = shalt.err (!%p4713_p5)
}
  0x66   :  { %98 = dma.hbm_to_vmem [thread:$0]  %s5010_s9, 1024, %s93_s18, [#allocation12], %s4758_s3, %s4758_s3, %s4759_s27  }
  0x67   :  { %4739 = dma.done.wait [#allocation3], 448  }
  0x68   :  { %4740 = vsyncadd [#allocation3], 4294966848 }
  0x69   :  { %4741 = dma.done.wait [#allocation6], 41472  }
  0x6a   :  { %4742 = vsyncadd [#allocation6], 4294925824 }
  0x6b   :  { %4743 = dma.done.wait [#allocation9], 10240  }
  0x6c   :  { %4744 = vsyncadd [#allocation9], 4294957056 }
  0x6d   :  { %4745 = dma.done.wait [#allocation12], 1024  }
  0x6e   :  { %4746 = vsyncadd [#allocation12], 4294966272  ;;  %v4761_v0 = vmov 0   ;;  %v3971_v1 = vld [vmem:[#allocation5 + $0x4] ss:$16 sps:$4 sm:$0xff]   ;;  %vm1346_vm0 = vcmask 130048  }
  0x6f   :  { %1505 = vmatprep.mubr.bf16.mxu1 %v4761_v0  ;;  %v3973_v2 = vld [vmem:[#allocation5 + $0x604] ss:$16 sps:$4 sm:$0xff]   ;;  %1350 = vmatprep.subr.bf16.mxu0 %v3971_v1  ;;  %v3975_v3 = vld [vmem:[#allocation5] ss:$16 sps:$4 sm:$0xff]   ;;  %v3979_v6 = vld [vmem:[#allocation5 + $0x8] ss:$16 sps:$4 sm:$0xff]  }
  0x70   :  { %v3976_v4 = vld [vmem:[#allocation5 + $0x600] ss:$16 sps:$4 sm:$0xff]   ;;  %1473 = vmatprep.subr.bf16.mxu1 %v3973_v2  ;;  %v3977_v5 = vld [vmem:[#allocation5 + $0x24] ss:$16 sps:$4 sm:$0xff]   ;;  %1351 = vmatpush1.bf16.msra.mxu0 %v3975_v3  ;;  %v3981_v7 = vld [vmem:[#allocation5 + $0xc] ss:$16 sps:$4 sm:$0xff]  }
  0x71   :  { %1474 = vmatpush1.bf16.msra.mxu1 %v3976_v4  ;;  %1352 = vmatprep.subr.bf16.mxu0 %v3977_v5  ;;  %v3982_v8 = vld [vmem:[#allocation5 + $0x20] ss:$16 sps:$4 sm:$0xff]   ;;  %v3983_v9 = vld [vmem:[#allocation2 + $0x18] ss:$0 sps:$4 sm:$0xff]   ;;  %v3984_v10 = vld [vmem:[#allocation5 + $0x44] ss:$16 sps:$4 sm:$0xff]  }
  0x72   :  { %1514 = vmatprep.subr.bf16.mxu1 %v3981_v7  ;;  %v3986_v11 = vld [vmem:[#allocation5 + $0x28] ss:$16 sps:$4 sm:$0xff]   ;;  %v3988_v12 = vld [vmem:[#allocation5 + $0x2c] ss:$16 sps:$4 sm:$0xff]   ;;  %v3989_v13 = vld [vmem:[#allocation5 + $0x40] ss:$16 sps:$4 sm:$0xff]  }
  0x73   :  { %v3990_v14 = vld [vmem:[#allocation5 + $0x64] ss:$16 sps:$4 sm:$0xff]   ;;  %v3994_v15 = vld [vmem:[#allocation5 + $0x4c] ss:$16 sps:$4 sm:$0xff]   ;;  %v3992_v16 = vld [vmem:[#allocation5 + $0x48] ss:$16 sps:$4 sm:$0xff]  }
  0x74   :  { %3640 = vmatmul.mubr.msk.bf16.vlgmr.msra.gmra.mrb[0].mxu1 %vm1346_vm0, %v3983_v9  ;;  %1353 = vmatpush1.bf16.msra.mxu0 %v3982_v8  ;;  %v3995_v17 = vld [vmem:[#allocation5 + $0x60] ss:$16 sps:$4 sm:$0xff]   ;;  %v3996_v18 = vld [vmem:[#allocation5 + $0x84] ss:$16 sps:$4 sm:$0xff]   ;;  %v4000_v19 = vld [vmem:[#allocation5 + $0x6c] ss:$16 sps:$4 sm:$0xff]  }
  0x75   :  { %1515 = vmatpush1.bf16.msra.mxu1 %v3979_v6  ;;  %1354 = vmatprep.subr.bf16.mxu0 %v3984_v10  ;;  %v3998_v20 = vld [vmem:[#allocation5 + $0x68] ss:$16 sps:$4 sm:$0xff]   ;;  %v4001_v21 = vld [vmem:[#allocation5 + $0x80] ss:$16 sps:$4 sm:$0xff]   ;;  %v4002_v22 = vld [vmem:[#allocation5 + $0xa4] ss:$16 sps:$4 sm:$0xff]  }
  0x76   :  { %1516 = vmatprep.subr.bf16.mxu1 %v3988_v12  ;;  %v4006_v23 = vld [vmem:[#allocation5 + $0x8c] ss:$16 sps:$4 sm:$0xff]   ;;  %v4004_v24 = vld [vmem:[#allocation5 + $0x88] ss:$16 sps:$4 sm:$0xff]   ;;  %v4007_v25 = vld [vmem:[#allocation5 + $0xa0] ss:$16 sps:$4 sm:$0xff]  }
  0x77   :  { %v4008_v26 = vld [vmem:[#allocation5 + $0xc4] ss:$16 sps:$4 sm:$0xff]   ;;  %v4012_v27 = vld [vmem:[#allocation5 + $0xac] ss:$16 sps:$4 sm:$0xff]   ;;  %v4010_v28 = vld [vmem:[#allocation5 + $0xa8] ss:$16 sps:$4 sm:$0xff]  }
  0x78   :  { %1355 = vmatpush1.bf16.msra.mxu0 %v3989_v13  ;;  %v4013_v29 = vld [vmem:[#allocation5 + $0xc0] ss:$16 sps:$4 sm:$0xff]   ;;  %v4014_v30 = vld [vmem:[#allocation5 + $0xe4] ss:$16 sps:$4 sm:$0xff]   ;;  %v4018_v31 = vld [vmem:[#allocation5 + $0xcc] ss:$16 sps:$4 sm:$0xff]  }
  0x79   :  { %1517 = vmatpush1.bf16.msra.mxu1 %v3986_v11  ;;  %1356 = vmatprep.subr.bf16.mxu0 %v3990_v14  ;;  %v4016_v32 = vld [vmem:[#allocation5 + $0xc8] ss:$16 sps:$4 sm:$0xff]   ;;  %v4019_v33 = vld [vmem:[#allocation5 + $0xe0] ss:$16 sps:$4 sm:$0xff]   ;;  %v4020_v34 = vld [vmem:[#allocation5 + $0x104] ss:$16 sps:$4 sm:$0xff]  }
  0x7a   :  { %1518 = vmatprep.subr.bf16.mxu1 %v3994_v15  ;;  %v4024_v35 = vld [vmem:[#allocation5 + $0xec] ss:$16 sps:$4 sm:$0xff]   ;;  %v4022_v36 = vld [vmem:[#allocation5 + $0xe8] ss:$16 sps:$4 sm:$0xff]   ;;  %v4025_v37 = vld [vmem:[#allocation5 + $0x100] ss:$16 sps:$4 sm:$0xff]  }
  0x7b   :  { %v4026_v38 = vld [vmem:[#allocation5 + $0x124] ss:$16 sps:$4 sm:$0xff]   ;;  %v4030_v39 = vld [vmem:[#allocation5 + $0x10c] ss:$16 sps:$4 sm:$0xff]   ;;  %v4028_v40 = vld [vmem:[#allocation5 + $0x108] ss:$16 sps:$4 sm:$0xff]  }
  0x7c   :  { %1357 = vmatpush1.bf16.msra.mxu0 %v3995_v17  ;;  %v4031_v41 = vld [vmem:[#allocation5 + $0x120] ss:$16 sps:$4 sm:$0xff]   ;;  %v4032_v42 = vld [vmem:[#allocation5 + $0x144] ss:$16 sps:$4 sm:$0xff]   ;;  %v4036_v43 = vld [vmem:[#allocation5 + $0x12c] ss:$16 sps:$4 sm:$0xff]  }
  0x7d   :  { %1519 = vmatpush1.bf16.msra.mxu1 %v3992_v16  ;;  %1358 = vmatprep.subr.bf16.mxu0 %v3996_v18  ;;  %v4034_v44 = vld [vmem:[#allocation5 + $0x128] ss:$16 sps:$4 sm:$0xff]   ;;  %v4037_v45 = vld [vmem:[#allocation5 + $0x140] ss:$16 sps:$4 sm:$0xff]   ;;  %v4038_v46 = vld [vmem:[#allocation5 + $0x164] ss:$16 sps:$4 sm:$0xff]  }
  0x7e   :  { %1520 = vmatprep.subr.bf16.mxu1 %v4000_v19  ;;  %v4042_v47 = vld [vmem:[#allocation5 + $0x14c] ss:$16 sps:$4 sm:$0xff]   ;;  %v4040_v48 = vld [vmem:[#allocation5 + $0x148] ss:$16 sps:$4 sm:$0xff]   ;;  %v4043_v50 = vld [vmem:[#allocation5 + $0x160] ss:$16 sps:$4 sm:$0xff]  }
  0x7f   :  { %v120_v49 = vld [vmem:[#allocation2] sm:$0xff]  ;;  %v4048_v53 = vld [vmem:[#allocation5 + $0x16c] ss:$16 sps:$4 sm:$0xff]   ;;  %v4049_v55 = vld [vmem:[#allocation5 + $0x180] ss:$16 sps:$4 sm:$0xff]   ;;  %vm4763_vm1 = vmmov 0  }
  0x80   :  { %1359 = vmatpush1.bf16.msra.mxu0 %v4001_v21  ;;  %v4044_v51 = vld [vmem:[#allocation5 + $0x184] ss:$16 sps:$4 sm:$0xff]   ;;  %v3438_v52 = vcombine.high %v120_v49, %v120_v49  ;;  %v4046_v54 = vld [vmem:[#allocation5 + $0x168] ss:$16 sps:$4 sm:$0xff]   ;;  %v4054_v57 = vld [vmem:[#allocation5 + $0x18c] ss:$16 sps:$4 sm:$0xff]   ;;  %v3437_v7 = vcombine.low %v120_v49, %v120_v49 }
  0x81   :  { %1521 = vmatpush1.bf16.msra.mxu1 %v3998_v20  ;;  %1360 = vmatprep.subr.bf16.mxu0 %v4002_v22  ;;  %v4050_v56 = vld [vmem:[#allocation5 + $0x1a4] ss:$16 sps:$4 sm:$0xff]   ;;  %v4052_v58 = vld [vmem:[#allocation5 + $0x188] ss:$16 sps:$4 sm:$0xff]   ;;  %v4055_v59 = vld [vmem:[#allocation5 + $0x1a0] ss:$16 sps:$4 sm:$0xff]  }
  0x82   :  { %1522 = vmatprep.subr.bf16.mxu1 %v4006_v23  ;;  %1382 = vmatprep.mubr.bf16.mxu0 %v3438_v52  ;;  %v4056_v60 = vld [vmem:[#allocation5 + $0x1c4] ss:$16 sps:$4 sm:$0xff]   ;;  %v4060_v61 = vld [vmem:[#allocation5 + $0x1ac] ss:$16 sps:$4 sm:$0xff]   ;;  %v4058_v62 = vld [vmem:[#allocation5 + $0x1a8] ss:$16 sps:$4 sm:$0xff]  }
  0x83   :  { %1546 = vmatprep.mubr.bf16.mxu1 %v3438_v52  ;;  %v4061_v63 = vld [vmem:[#allocation5 + $0x1c0] ss:$16 sps:$4 sm:$0xff]   ;;  %v4062_v1 = vld [vmem:[#allocation5 + $0x1e4] ss:$16 sps:$4 sm:$0xff]   ;;  %v4066_v2 = vld [vmem:[#allocation5 + $0x1cc] ss:$16 sps:$4 sm:$0xff]  }
  0x84   :  { %1361 = vmatpush1.bf16.msra.mxu0 %v4007_v25  ;;  %v4064_v3 = vld [vmem:[#allocation5 + $0x1c8] ss:$16 sps:$4 sm:$0xff]   ;;  %v4067_v4 = vld [vmem:[#allocation5 + $0x1e0] ss:$16 sps:$4 sm:$0xff]   ;;  %v4072_v5 = vld [vmem:[#allocation5 + $0x204] ss:$16 sps:$4 sm:$0xff]  }
  0x85   :  { %1523 = vmatpush1.bf16.msra.mxu1 %v4004_v24  ;;  %1362 = vmatprep.subr.bf16.mxu0 %v4008_v26  ;;  %v4075_v6 = vld [vmem:[#allocation5 + $0x1ec] ss:$16 sps:$4 sm:$0xff]   ;;  %v4070_v8 = vld [vmem:[#allocation5 + $0x200] ss:$16 sps:$4 sm:$0xff]   ;;  %v4073_v9 = vld [vmem:[#allocation5 + $0x1e8] ss:$16 sps:$4 sm:$0xff]  }
  0x86   :  { %1524 = vmatprep.subr.bf16.mxu1 %v4012_v27  ;;  %v4078_v10 = vld [vmem:[#allocation5 + $0x224] ss:$16 sps:$4 sm:$0xff]   ;;  %v4081_v11 = vld [vmem:[#allocation5 + $0x20c] ss:$16 sps:$4 sm:$0xff]   ;;  %v4076_v12 = vld [vmem:[#allocation5 + $0x220] ss:$16 sps:$4 sm:$0xff]  }
  0x87   :  { %v4079_v13 = vld [vmem:[#allocation5 + $0x208] ss:$16 sps:$4 sm:$0xff]   ;;  %v4084_v14 = vld [vmem:[#allocation5 + $0x244] ss:$16 sps:$4 sm:$0xff]   ;;  %v4087_v15 = vld [vmem:[#allocation5 + $0x22c] ss:$16 sps:$4 sm:$0xff]  }
  0x88   :  { %1363 = vmatpush1.bf16.msra.mxu0 %v4013_v29  ;;  %v4082_v16 = vld [vmem:[#allocation5 + $0x240] ss:$16 sps:$4 sm:$0xff]   ;;  %v4085_v17 = vld [vmem:[#allocation5 + $0x228] ss:$16 sps:$4 sm:$0xff]   ;;  %v4090_v18 = vld [vmem:[#allocation5 + $0x264] ss:$16 sps:$4 sm:$0xff]  }
  0x89   :  { %1525 = vmatpush1.bf16.msra.mxu1 %v4010_v28  ;;  %1364 = vmatprep.subr.bf16.mxu0 %v4014_v30  ;;  %v4093_v19 = vld [vmem:[#allocation5 + $0x24c] ss:$16 sps:$4 sm:$0xff]   ;;  %v4088_v20 = vld [vmem:[#allocation5 + $0x260] ss:$16 sps:$4 sm:$0xff]   ;;  %v4091_v21 = vld [vmem:[#allocation5 + $0x248] ss:$16 sps:$4 sm:$0xff]  }
  0x8a   :  { %1526 = vmatprep.subr.bf16.mxu1 %v4018_v31  ;;  %v4096_v22 = vld [vmem:[#allocation5 + $0x284] ss:$16 sps:$4 sm:$0xff]   ;;  %v4099_v23 = vld [vmem:[#allocation5 + $0x26c] ss:$16 sps:$4 sm:$0xff]   ;;  %v4094_v24 = vld [vmem:[#allocation5 + $0x280] ss:$16 sps:$4 sm:$0xff]  }
  0x8b   :  { %v4097_v25 = vld [vmem:[#allocation5 + $0x268] ss:$16 sps:$4 sm:$0xff]   ;;  %v4102_v26 = vld [vmem:[#allocation5 + $0x2a4] ss:$16 sps:$4 sm:$0xff]   ;;  %v4105_v27 = vld [vmem:[#allocation5 + $0x28c] ss:$16 sps:$4 sm:$0xff]  }
  0x8c   :  { %1365 = vmatpush1.bf16.msra.mxu0 %v4019_v33  ;;  %v4100_v28 = vld [vmem:[#allocation5 + $0x2a0] ss:$16 sps:$4 sm:$0xff]   ;;  %v4103_v29 = vld [vmem:[#allocation5 + $0x288] ss:$16 sps:$4 sm:$0xff]   ;;  %v4108_v30 = vld [vmem:[#allocation5 + $0x2c4] ss:$16 sps:$4 sm:$0xff]  }
  0x8d   :  { %1527 = vmatpush1.bf16.msra.mxu1 %v4016_v32  ;;  %1366 = vmatprep.subr.bf16.mxu0 %v4020_v34  ;;  %v4111_v31 = vld [vmem:[#allocation5 + $0x2ac] ss:$16 sps:$4 sm:$0xff]   ;;  %v4106_v33 = vld [vmem:[#allocation5 + $0x2c0] ss:$16 sps:$4 sm:$0xff]   ;;  %v4109_v34 = vld [vmem:[#allocation5 + $0x2a8] ss:$16 sps:$4 sm:$0xff]  }
  0x8e   :  { %1528 = vmatprep.subr.bf16.mxu1 %v4024_v35  ;;  %v4912_v32 = vld [vmem:[#allocation2 + $0x8] sm:$0xff]  ;;  %v4138_v52 = vld [vmem:[#allocation5 + $0x364] ss:$16 sps:$4 sm:$0xff]   ;;  %s4764_s21 = smov [#allocation13]  }
  0x8f   :  { %v3440_v35 = vcombine.high %v4912_v32, %v4912_v32  ;;  %v4135_v49 = vld [vmem:[#allocation5 + $0x32c] ss:$16 sps:$4 sm:$0xff]   ;;  %s3425_s22 = sshll.u32 %s4764_s21, 4  ;;  %s3426_s22 = int_to_ptr.vmem [resolvable:$true] %s3425_s22 }
  0x90   :  { %1367 = vmatpush1.bf16.msra.mxu0 %v4025_v37  ;;  %v4117_v37 = vld [vmem:[#allocation5 + $0x2cc] ss:$16 sps:$4 sm:$0xff]   ;;  %p4722_p7 = scmp.lt.s32.totalorder %s3426_s22, %s3426_s22 }
  0x91   :  { %1529 = vmatpush1.bf16.msra.mxu1 %v4022_v36  ;;  %1368 = vmatprep.subr.bf16.mxu0 %v4026_v38  ;;  %v4114_v36 = vld [vmem:[#allocation5 + $0x2e4] ss:$16 sps:$4 sm:$0xff]   ;;  %v4112_v38 = vld [vmem:[#allocation5 + $0x2e0] ss:$16 sps:$4 sm:$0xff]  }
  0x92   :  { %1530 = vmatprep.subr.bf16.mxu1 %v4030_v39  ;;  %v4115_v39 = vld [vmem:[#allocation5 + $0x2c8] ss:$16 sps:$4 sm:$0xff]  }
  0x94   :  { %1369 = vmatpush1.bf16.msra.mxu0 %v4031_v41  ;;  %v4123_v41 = vld [vmem:[#allocation5 + $0x2ec] ss:$16 sps:$4 sm:$0xff]  }
  0x95   :  { %1531 = vmatpush1.bf16.msra.mxu1 %v4028_v40  ;;  %1370 = vmatprep.subr.bf16.mxu0 %v4032_v42  ;;  %v4120_v40 = vld [vmem:[#allocation5 + $0x304] ss:$16 sps:$4 sm:$0xff]   ;;  %v4118_v42 = vld [vmem:[#allocation5 + $0x300] ss:$16 sps:$4 sm:$0xff]  }
  0x96   :  { %1532 = vmatprep.subr.bf16.mxu1 %v4036_v43  ;;  %v4121_v43 = vld [vmem:[#allocation5 + $0x2e8] ss:$16 sps:$4 sm:$0xff]  }
  0x98   :  { %1371 = vmatpush1.bf16.msra.mxu0 %v4037_v45  ;;  %v4129_v45 = vld [vmem:[#allocation5 + $0x30c] ss:$16 sps:$4 sm:$0xff]  }
  0x99   :  { %1533 = vmatpush1.bf16.msra.mxu1 %v4034_v44  ;;  %1372 = vmatprep.subr.bf16.mxu0 %v4038_v46  ;;  %v4126_v44 = vld [vmem:[#allocation5 + $0x324] ss:$16 sps:$4 sm:$0xff]   ;;  %v4124_v46 = vld [vmem:[#allocation5 + $0x320] ss:$16 sps:$4 sm:$0xff]  }
  0x9a   :  { %1534 = vmatprep.subr.bf16.mxu1 %v4042_v47  ;;  %v4127_v47 = vld [vmem:[#allocation5 + $0x308] ss:$16 sps:$4 sm:$0xff]  }
  0x9c   :  { %1373 = vmatpush1.bf16.msra.mxu0 %v4043_v50  ;;  %v4130_v50 = vld [vmem:[#allocation5 + $0x340] ss:$16 sps:$4 sm:$0xff]  }
  0x9d   :  { %1535 = vmatpush1.bf16.msra.mxu1 %v4040_v48  ;;  %1374 = vmatprep.subr.bf16.mxu0 %v4044_v51  ;;  %v4132_v48 = vld [vmem:[#allocation5 + $0x344] ss:$16 sps:$4 sm:$0xff]   ;;  %v4133_v51 = vld [vmem:[#allocation5 + $0x328] ss:$16 sps:$4 sm:$0xff]  }
  0x9e   :  { %1536 = vmatprep.subr.bf16.mxu1 %v4048_v53  ;;  %v4141_v53 = vld [vmem:[#allocation5 + $0x34c] ss:$16 sps:$4 sm:$0xff]  }
  0xa0   :  { %1375 = vmatpush1.bf16.msra.mxu0 %v4049_v55  ;;  %v4139_v55 = vld [vmem:[#allocation5 + $0x348] ss:$16 sps:$4 sm:$0xff]  }
  0xa1   :  { %1537 = vmatpush1.bf16.msra.mxu1 %v4046_v54  ;;  %1376 = vmatprep.subr.bf16.mxu0 %v4050_v56  ;;  %v4136_v54 = vld [vmem:[#allocation5 + $0x360] ss:$16 sps:$4 sm:$0xff]   ;;  %v4144_v56 = vld [vmem:[#allocation5 + $0x384] ss:$16 sps:$4 sm:$0xff]  }
  0xa2   :  { %1538 = vmatprep.subr.bf16.mxu1 %v4054_v57  ;;  %v4147_v57 = vld [vmem:[#allocation5 + $0x36c] ss:$16 sps:$4 sm:$0xff]  }
  0xa4   :  { %1377 = vmatpush1.bf16.msra.mxu0 %v4055_v59  ;;  %v4145_v59 = vld [vmem:[#allocation5 + $0x368] ss:$16 sps:$4 sm:$0xff]  }
  0xa5   :  { %1539 = vmatpush1.bf16.msra.mxu1 %v4052_v58  ;;  %1378 = vmatprep.subr.bf16.mxu0 %v4056_v60  ;;  %v4142_v58 = vld [vmem:[#allocation5 + $0x380] ss:$16 sps:$4 sm:$0xff]   ;;  %v4150_v60 = vld [vmem:[#allocation5 + $0x3a4] ss:$16 sps:$4 sm:$0xff]  }
  0xa6   :  { %1540 = vmatprep.subr.bf16.mxu1 %v4060_v61  ;;  %v4153_v61 = vld [vmem:[#allocation5 + $0x38c] ss:$16 sps:$4 sm:$0xff]  }
  0xa8   :  { %1379 = vmatpush1.bf16.msra.mxu0 %v4061_v63  ;;  %v4151_v63 = vld [vmem:[#allocation5 + $0x388] ss:$16 sps:$4 sm:$0xff]  }
  0xa9   :  { %1541 = vmatpush1.bf16.msra.mxu1 %v4058_v62  ;;  %1380 = vmatprep.subr.bf16.mxu0 %v4062_v1  ;;  %v4148_v62 = vld [vmem:[#allocation5 + $0x3a0] ss:$16 sps:$4 sm:$0xff]   ;;  %v4156_v1 = vld [vmem:[#allocation5 + $0x3c4] ss:$16 sps:$4 sm:$0xff]  }
  0xaa   :  { %1542 = vmatprep.subr.bf16.mxu1 %v4066_v2  ;;  %v4159_v2 = vld [vmem:[#allocation5 + $0x3ac] ss:$16 sps:$4 sm:$0xff]  }
  0xac   :  { %1381 = vmatpush1.bf16.msra.mxu0 %v4067_v4  ;;  %v4157_v4 = vld [vmem:[#allocation5 + $0x3a8] ss:$16 sps:$4 sm:$0xff]  }
  0xad   :  { %1543 = vmatpush1.bf16.msra.mxu1 %v4064_v3  ;;  %1391 = vmatprep.subr.bf16.mxu0 %v4072_v5  ;;  %v4154_v3 = vld [vmem:[#allocation5 + $0x3c0] ss:$16 sps:$4 sm:$0xff]   ;;  %v4162_v5 = vld [vmem:[#allocation5 + $0x3e4] ss:$16 sps:$4 sm:$0xff]  }
  0xae   :  { %1544 = vmatprep.subr.bf16.mxu1 %v4075_v6  ;;  %v4165_v6 = vld [vmem:[#allocation5 + $0x3cc] ss:$16 sps:$4 sm:$0xff]  }
  0xaf   :  { %1383 = vmatmul.mubr.bf16.vlgmr.msra.gmra.mrb[0].mxu0 %v3437_v7 }
  0xb0   :  { %1392 = vmatpush1.bf16.msra.mxu0 %v4070_v8  ;;  %1423 = vmatprep.mubr.bf16.mxu0 %v3440_v35  ;;  %v4163_v8 = vld [vmem:[#allocation5 + $0x3c8] ss:$16 sps:$4 sm:$0xff]  }
  0xb1   :  { %1545 = vmatpush1.bf16.msra.mxu1 %v4073_v9  ;;  %1393 = vmatprep.subr.bf16.mxu0 %v4078_v10  ;;  %v4170_v9 = vld [vmem:[#allocation5 + $0x404] ss:$16 sps:$4 sm:$0xff]   ;;  %v4173_v10 = vld [vmem:[#allocation5 + $0x3ec] ss:$16 sps:$4 sm:$0xff]  }
  0xb2   :  { %1555 = vmatprep.subr.bf16.mxu1 %v4081_v11  ;;  %v3439_v11 = vcombine.low %v4912_v32, %v4912_v32  ;;  %v4200_v32 = vld [vmem:[#allocation5 + $0x4a4] ss:$16 sps:$4 sm:$0xff]  }
  0xb4   :  { %1547 = vmatmul.mubr.bf16.vlgmr.msra.gmra.mrb[4].mxu1 %v3437_v7  ;;  %1394 = vmatpush1.bf16.msra.mxu0 %v4076_v12  ;;  %v4160_v7 = vld [vmem:[#allocation5 + $0x3e0] ss:$16 sps:$4 sm:$0xff]  }
  0xb5   :  { %1556 = vmatpush1.bf16.msra.mxu1 %v4079_v13  ;;  %1395 = vmatprep.subr.bf16.mxu0 %v4084_v14  ;;  %v4168_v12 = vld [vmem:[#allocation5 + $0x400] ss:$16 sps:$4 sm:$0xff]   ;;  %v4171_v13 = vld [vmem:[#allocation5 + $0x3e8] ss:$16 sps:$4 sm:$0xff]   ;;  %v4176_v14 = vld [vmem:[#allocation5 + $0x424] ss:$16 sps:$4 sm:$0xff]  }
  0xb6   :  { %1557 = vmatprep.subr.bf16.mxu1 %v4087_v15  ;;  %1587 = vmatprep.mubr.bf16.mxu1 %v3440_v35  ;;  %v4179_v15 = vld [vmem:[#allocation5 + $0x40c] ss:$16 sps:$4 sm:$0xff]   ;;  %v4201_v35 = vld [vmem:[#allocation5 + $0x488] ss:$16 sps:$4 sm:$0xff]  }
  0xb8   :  { %1396 = vmatpush1.bf16.msra.mxu0 %v4082_v16  ;;  %v4918_v16 = vld [vmem:[#allocation2 + $0x10] sm:$0xff] }
  0xb9   :  { %1558 = vmatpush1.bf16.msra.mxu1 %v4085_v17  ;;  %1397 = vmatprep.subr.bf16.mxu0 %v4090_v18  ;;  %v3442_v17 = vcombine.high %v4918_v16, %v4918_v16  ;;  %v4174_v18 = vld [vmem:[#allocation5 + $0x420] ss:$16 sps:$4 sm:$0xff]  }
  0xba   :  { %1559 = vmatprep.subr.bf16.mxu1 %v4093_v19  ;;  %v4177_v19 = vld [vmem:[#allocation5 + $0x408] ss:$16 sps:$4 sm:$0xff]  }
  0xbc   :  { %1398 = vmatpush1.bf16.msra.mxu0 %v4088_v20  ;;  %v4182_v20 = vld [vmem:[#allocation5 + $0x444] ss:$16 sps:$4 sm:$0xff]  }
  0xbd   :  { %1560 = vmatpush1.bf16.msra.mxu1 %v4091_v21  ;;  %1399 = vmatprep.subr.bf16.mxu0 %v4096_v22  ;;  %v4185_v21 = vld [vmem:[#allocation5 + $0x42c] ss:$16 sps:$4 sm:$0xff]   ;;  %v4180_v22 = vld [vmem:[#allocation5 + $0x440] ss:$16 sps:$4 sm:$0xff]  }
  0xbe   :  { %1561 = vmatprep.subr.bf16.mxu1 %v4099_v23  ;;  %v4183_v23 = vld [vmem:[#allocation5 + $0x428] ss:$16 sps:$4 sm:$0xff]  }
  0xc0   :  { %1400 = vmatpush1.bf16.msra.mxu0 %v4094_v24  ;;  %v4188_v24 = vld [vmem:[#allocation5 + $0x464] ss:$16 sps:$4 sm:$0xff]  }
  0xc1   :  { %1562 = vmatpush1.bf16.msra.mxu1 %v4097_v25  ;;  %1401 = vmatprep.subr.bf16.mxu0 %v4102_v26  ;;  %v4191_v25 = vld [vmem:[#allocation5 + $0x44c] ss:$16 sps:$4 sm:$0xff]   ;;  %v4186_v26 = vld [vmem:[#allocation5 + $0x460] ss:$16 sps:$4 sm:$0xff]  }
  0xc2   :  { %1563 = vmatprep.subr.bf16.mxu1 %v4105_v27  ;;  %v4189_v27 = vld [vmem:[#allocation5 + $0x448] ss:$16 sps:$4 sm:$0xff]  }
  0xc4   :  { %1402 = vmatpush1.bf16.msra.mxu0 %v4100_v28  ;;  %v4194_v28 = vld [vmem:[#allocation5 + $0x484] ss:$16 sps:$4 sm:$0xff]  }
  0xc5   :  { %1564 = vmatpush1.bf16.msra.mxu1 %v4103_v29  ;;  %1403 = vmatprep.subr.bf16.mxu0 %v4108_v30  ;;  %v4197_v29 = vld [vmem:[#allocation5 + $0x46c] ss:$16 sps:$4 sm:$0xff]   ;;  %v4192_v30 = vld [vmem:[#allocation5 + $0x480] ss:$16 sps:$4 sm:$0xff]  }
  0xc6   :  { %1565 = vmatprep.subr.bf16.mxu1 %v4111_v31  ;;  %v4195_v31 = vld [vmem:[#allocation5 + $0x468] ss:$16 sps:$4 sm:$0xff]  }
  0xc8   :  { %1404 = vmatpush1.bf16.msra.mxu0 %v4106_v33  ;;  %v4203_v33 = vld [vmem:[#allocation5 + $0x48c] ss:$16 sps:$4 sm:$0xff]  }
  0xc9   :  { %1566 = vmatpush1.bf16.msra.mxu1 %v4109_v34  ;;  %1405 = vmatprep.subr.bf16.mxu0 %v4114_v36  ;;  %v4198_v34 = vld [vmem:[#allocation5 + $0x4a0] ss:$16 sps:$4 sm:$0xff]   ;;  %v4206_v36 = vld [vmem:[#allocation5 + $0x4c4] ss:$16 sps:$4 sm:$0xff]  }
  0xca   :  { %1567 = vmatprep.subr.bf16.mxu1 %v4117_v37  ;;  %v4209_v37 = vld [vmem:[#allocation5 + $0x4ac] ss:$16 sps:$4 sm:$0xff]  }
  0xcc   :  { %1406 = vmatpush1.bf16.msra.mxu0 %v4112_v38  ;;  %v4204_v38 = vld [vmem:[#allocation5 + $0x4c0] ss:$16 sps:$4 sm:$0xff]  }
  0xcd   :  { %1568 = vmatpush1.bf16.msra.mxu1 %v4115_v39  ;;  %1407 = vmatprep.subr.bf16.mxu0 %v4120_v40  ;;  %v4207_v39 = vld [vmem:[#allocation5 + $0x4a8] ss:$16 sps:$4 sm:$0xff]   ;;  %v4212_v40 = vld [vmem:[#allocation5 + $0x4e4] ss:$16 sps:$4 sm:$0xff]  }
  0xce   :  { %1569 = vmatprep.subr.bf16.mxu1 %v4123_v41  ;;  %v4215_v41 = vld [vmem:[#allocation5 + $0x4cc] ss:$16 sps:$4 sm:$0xff]  }
  0xd0   :  { %1408 = vmatpush1.bf16.msra.mxu0 %v4118_v42  ;;  %v4210_v42 = vld [vmem:[#allocation5 + $0x4e0] ss:$16 sps:$4 sm:$0xff]  }
  0xd1   :  { %1570 = vmatpush1.bf16.msra.mxu1 %v4121_v43  ;;  %1409 = vmatprep.subr.bf16.mxu0 %v4126_v44  ;;  %v4213_v43 = vld [vmem:[#allocation5 + $0x4c8] ss:$16 sps:$4 sm:$0xff]   ;;  %v4218_v44 = vld [vmem:[#allocation5 + $0x504] ss:$16 sps:$4 sm:$0xff]  }
  0xd2   :  { %1571 = vmatprep.subr.bf16.mxu1 %v4129_v45  ;;  %v4221_v45 = vld [vmem:[#allocation5 + $0x4ec] ss:$16 sps:$4 sm:$0xff]  }
  0xd4   :  { %1410 = vmatpush1.bf16.msra.mxu0 %v4124_v46  ;;  %v4216_v46 = vld [vmem:[#allocation5 + $0x500] ss:$16 sps:$4 sm:$0xff]  }
  0xd5   :  { %1572 = vmatpush1.bf16.msra.mxu1 %v4127_v47  ;;  %1411 = vmatprep.subr.bf16.mxu0 %v4132_v48  ;;  %v4219_v47 = vld [vmem:[#allocation5 + $0x4e8] ss:$16 sps:$4 sm:$0xff]   ;;  %v4224_v48 = vld [vmem:[#allocation5 + $0x524] ss:$16 sps:$4 sm:$0xff]  }
  0xd6   :  { %1573 = vmatprep.subr.bf16.mxu1 %v4135_v49  ;;  %v4227_v49 = vld [vmem:[#allocation5 + $0x50c] ss:$16 sps:$4 sm:$0xff]  }
  0xd8   :  { %1412 = vmatpush1.bf16.msra.mxu0 %v4130_v50  ;;  %v4222_v50 = vld [vmem:[#allocation5 + $0x520] ss:$16 sps:$4 sm:$0xff]  }
  0xd9   :  { %1574 = vmatpush1.bf16.msra.mxu1 %v4133_v51  ;;  %1413 = vmatprep.subr.bf16.mxu0 %v4138_v52  ;;  %v4225_v51 = vld [vmem:[#allocation5 + $0x508] ss:$16 sps:$4 sm:$0xff]   ;;  %v4230_v52 = vld [vmem:[#allocation5 + $0x544] ss:$16 sps:$4 sm:$0xff]  }
  0xda   :  { %1575 = vmatprep.subr.bf16.mxu1 %v4141_v53  ;;  %v4233_v53 = vld [vmem:[#allocation5 + $0x52c] ss:$16 sps:$4 sm:$0xff]  }
  0xdc   :  { %1414 = vmatpush1.bf16.msra.mxu0 %v4136_v54  ;;  %v4228_v54 = vld [vmem:[#allocation5 + $0x540] ss:$16 sps:$4 sm:$0xff]  }
  0xdd   :  { %1576 = vmatpush1.bf16.msra.mxu1 %v4139_v55  ;;  %1415 = vmatprep.subr.bf16.mxu0 %v4144_v56  ;;  %v4231_v55 = vld [vmem:[#allocation5 + $0x528] ss:$16 sps:$4 sm:$0xff]   ;;  %v4236_v56 = vld [vmem:[#allocation5 + $0x564] ss:$16 sps:$4 sm:$0xff]  }
  0xde   :  { %1577 = vmatprep.subr.bf16.mxu1 %v4147_v57  ;;  %v4239_v57 = vld [vmem:[#allocation5 + $0x54c] ss:$16 sps:$4 sm:$0xff]  }
  0xe0   :  { %1416 = vmatpush1.bf16.msra.mxu0 %v4142_v58  ;;  %v4234_v58 = vld [vmem:[#allocation5 + $0x560] ss:$16 sps:$4 sm:$0xff]  }
  0xe1   :  { %1578 = vmatpush1.bf16.msra.mxu1 %v4145_v59  ;;  %1417 = vmatprep.subr.bf16.mxu0 %v4150_v60  ;;  %v4237_v59 = vld [vmem:[#allocation5 + $0x548] ss:$16 sps:$4 sm:$0xff]   ;;  %v4242_v60 = vld [vmem:[#allocation5 + $0x584] ss:$16 sps:$4 sm:$0xff]  }
  0xe2   :  { %1579 = vmatprep.subr.bf16.mxu1 %v4153_v61  ;;  %v4245_v61 = vld [vmem:[#allocation5 + $0x56c] ss:$16 sps:$4 sm:$0xff]  }
  0xe4   :  { %1418 = vmatpush1.bf16.msra.mxu0 %v4148_v62  ;;  %v4240_v62 = vld [vmem:[#allocation5 + $0x580] ss:$16 sps:$4 sm:$0xff]  }
  0xe5   :  { %1580 = vmatpush1.bf16.msra.mxu1 %v4151_v63  ;;  %1419 = vmatprep.subr.bf16.mxu0 %v4156_v1  ;;  %v4243_v63 = vld [vmem:[#allocation5 + $0x568] ss:$16 sps:$4 sm:$0xff]   ;;  %v4248_v1 = vld [vmem:[#allocation5 + $0x5a4] ss:$16 sps:$4 sm:$0xff]  }
  0xe6   :  { %1581 = vmatprep.subr.bf16.mxu1 %v4159_v2  ;;  %v4251_v2 = vld [vmem:[#allocation5 + $0x58c] ss:$16 sps:$4 sm:$0xff]  }
  0xe8   :  { %1420 = vmatpush1.bf16.msra.mxu0 %v4154_v3  ;;  %v4246_v3 = vld [vmem:[#allocation5 + $0x5a0] ss:$16 sps:$4 sm:$0xff]  }
  0xe9   :  { %1582 = vmatpush1.bf16.msra.mxu1 %v4157_v4  ;;  %1421 = vmatprep.subr.bf16.mxu0 %v4162_v5  ;;  %v4249_v4 = vld [vmem:[#allocation5 + $0x588] ss:$16 sps:$4 sm:$0xff]   ;;  %v4254_v5 = vld [vmem:[#allocation5 + $0x5c4] ss:$16 sps:$4 sm:$0xff]  }
  0xea   :  { %1583 = vmatprep.subr.bf16.mxu1 %v4165_v6  ;;  %v4257_v6 = vld [vmem:[#allocation5 + $0x5ac] ss:$16 sps:$4 sm:$0xff]  }
  0xec   :  { %1422 = vmatpush1.bf16.msra.mxu0 %v4160_v7  ;;  %v4252_v7 = vld [vmem:[#allocation5 + $0x5c0] ss:$16 sps:$4 sm:$0xff]  }
  0xed   :  { %1584 = vmatpush1.bf16.msra.mxu1 %v4163_v8  ;;  %1432 = vmatprep.subr.bf16.mxu0 %v4170_v9  ;;  %v4255_v8 = vld [vmem:[#allocation5 + $0x5a8] ss:$16 sps:$4 sm:$0xff]   ;;  %v4260_v9 = vld [vmem:[#allocation5 + $0x5e4] ss:$16 sps:$4 sm:$0xff]  }
  0xee   :  { %1585 = vmatprep.subr.bf16.mxu1 %v4173_v10  ;;  %v4263_v10 = vld [vmem:[#allocation5 + $0x5cc] ss:$16 sps:$4 sm:$0xff]  }
  0xef   :  { %1424 = vmatmul.mubr.bf16.vlgmr.msra.gmra.mrb[0].mxu0 %v3439_v11 }
  0xf0   :  { %1433 = vmatpush1.bf16.msra.mxu0 %v4168_v12  ;;  %1464 = vmatprep.mubr.bf16.mxu0 %v3442_v17  ;;  %v4261_v12 = vld [vmem:[#allocation5 + $0x5c8] ss:$16 sps:$4 sm:$0xff]  }
  0xf1   :  { %1586 = vmatpush1.bf16.msra.mxu1 %v4171_v13  ;;  %1434 = vmatprep.subr.bf16.mxu0 %v4176_v14  ;;  %v4268_v13 = vld [vmem:[#allocation5 + $0x5ec] ss:$16 sps:$4 sm:$0xff]   ;;  %v4274_v14 = vld [vmem:[#allocation7 + $0x4] ss:$16 sps:$4 sm:$0xff]  }
  0xf2   :  { %1596 = vmatprep.subr.bf16.mxu1 %v4179_v15  ;;  %v4266_v15 = vld [vmem:[#allocation5 + $0x5e8] ss:$16 sps:$4 sm:$0xff]  }
  0xf4   :  { %1588 = vmatmul.mubr.bf16.vlgmr.msra.gmra.mrb[4].mxu1 %v3439_v11  ;;  %1435 = vmatpush1.bf16.msra.mxu0 %v4174_v18  ;;  %v4258_v11 = vld [vmem:[#allocation5 + $0x5e0] ss:$16 sps:$4 sm:$0xff]   ;;  %v3441_v18 = vcombine.low %v4918_v16, %v4918_v16  ;;  %v4292_v16 = vld [vmem:[#allocation7 + $0x64] ss:$16 sps:$4 sm:$0xff]  }
  0xf5   :  { %1597 = vmatpush1.bf16.msra.mxu1 %v4177_v19  ;;  %1436 = vmatprep.subr.bf16.mxu0 %v4182_v20  ;;  %v4271_v19 = vld [vmem:[#allocation5 + $0x60c] ss:$16 sps:$4 sm:$0xff]   ;;  %v4280_v20 = vld [vmem:[#allocation7 + $0x24] ss:$16 sps:$4 sm:$0xff]  }
  0xf6   :  { %1598 = vmatprep.subr.bf16.mxu1 %v4185_v21  ;;  %1628 = vmatprep.mubr.bf16.mxu1 %v3442_v17  ;;  %v4272_v17 = vld [vmem:[#allocation7] ss:$16 sps:$4 sm:$0xff]   ;;  %v4269_v21 = vld [vmem:[#allocation5 + $0x608] ss:$16 sps:$4 sm:$0xff]  }
  0xf8   :  { %1437 = vmatpush1.bf16.msra.mxu0 %v4180_v22  ;;  %v4277_v22 = vld [vmem:[#allocation7 + $0xc] ss:$16 sps:$4 sm:$0xff]  }
  0xf9   :  { %1599 = vmatpush1.bf16.msra.mxu1 %v4183_v23  ;;  %1438 = vmatprep.subr.bf16.mxu0 %v4188_v24  ;;  %v4278_v23 = vld [vmem:[#allocation7 + $0x20] ss:$16 sps:$4 sm:$0xff]   ;;  %v4286_v24 = vld [vmem:[#allocation7 + $0x44] ss:$16 sps:$4 sm:$0xff]  }
  0xfa   :  { %1600 = vmatprep.subr.bf16.mxu1 %v4191_v25  ;;  %v4284_v25 = vld [vmem:[#allocation7 + $0x40] ss:$16 sps:$4 sm:$0xff]  }
  0xfc   :  { %1439 = vmatpush1.bf16.msra.mxu0 %v4186_v26  ;;  %v4290_v26 = vld [vmem:[#allocation7 + $0x60] ss:$16 sps:$4 sm:$0xff]  }
  0xfd   :  { %1601 = vmatpush1.bf16.msra.mxu1 %v4189_v27  ;;  %1440 = vmatprep.subr.bf16.mxu0 %v4194_v28  ;;  %v4298_v27 = vld [vmem:[#allocation7 + $0x84] ss:$16 sps:$4 sm:$0xff]   ;;  %v4275_v28 = vld [vmem:[#allocation7 + $0x8] ss:$16 sps:$4 sm:$0xff]  }
  0xfe   :  { %1602 = vmatprep.subr.bf16.mxu1 %v4197_v29  ;;  %v4283_v29 = vld [vmem:[#allocation7 + $0x2c] ss:$16 sps:$4 sm:$0xff]  }
 0x100   :  { %1441 = vmatpush1.bf16.msra.mxu0 %v4192_v30  ;;  %v4296_v30 = vld [vmem:[#allocation7 + $0x80] ss:$16 sps:$4 sm:$0xff]  }
 0x101   :  { %1603 = vmatpush1.bf16.msra.mxu1 %v4195_v31  ;;  %1442 = vmatprep.subr.bf16.mxu0 %v4200_v32  ;;  %v4304_v31 = vld [vmem:[#allocation7 + $0xa4] ss:$16 sps:$4 sm:$0xff]   ;;  %v4281_v32 = vld [vmem:[#allocation7 + $0x28] ss:$16 sps:$4 sm:$0xff]  }
 0x102   :  { %1604 = vmatprep.subr.bf16.mxu1 %v4203_v33  ;;  %v4584_v33 = vld [vmem:[#allocation2 + $0x18] ss:$0 sps:$4 sm:$0xff]  }
 0x104   :  { %1443 = vmatpush1.bf16.msra.mxu0 %v4198_v34  ;;  %v4289_v34 = vld [vmem:[#allocation7 + $0x4c] ss:$16 sps:$4 sm:$0xff]  }
 0x105   :  { %1605 = vmatpush1.bf16.msra.mxu1 %v4201_v35  ;;  %1444 = vmatprep.subr.bf16.mxu0 %v4206_v36  ;;  %v4310_v35 = vld [vmem:[#allocation7 + $0xc4] ss:$16 sps:$4 sm:$0xff]   ;;  %v4287_v36 = vld [vmem:[#allocation7 + $0x48] ss:$16 sps:$4 sm:$0xff]  }
 0x106   :  { %1606 = vmatprep.subr.bf16.mxu1 %v4209_v37  ;;  %v4295_v37 = vld [vmem:[#allocation7 + $0x6c] ss:$16 sps:$4 sm:$0xff]  }
 0x108   :  { %1445 = vmatpush1.bf16.msra.mxu0 %v4204_v38  ;;  %v4308_v38 = vld [vmem:[#allocation7 + $0xc0] ss:$16 sps:$4 sm:$0xff]  }
 0x109   :  { %1607 = vmatpush1.bf16.msra.mxu1 %v4207_v39  ;;  %1446 = vmatprep.subr.bf16.mxu0 %v4212_v40  ;;  %v4316_v39 = vld [vmem:[#allocation7 + $0xe4] ss:$16 sps:$4 sm:$0xff]  }
 0x10a   :  { %1608 = vmatprep.subr.bf16.mxu1 %v4215_v41  ;;  %v4293_v41 = vld [vmem:[#allocation7 + $0x68] ss:$16 sps:$4 sm:$0xff]  }
 0x10c   :  { %1447 = vmatpush1.bf16.msra.mxu0 %v4210_v42 }
 0x10d   :  { %1609 = vmatpush1.bf16.msra.mxu1 %v4213_v43  ;;  %1448 = vmatprep.subr.bf16.mxu0 %v4218_v44  ;;  %v4301_v43 = vld [vmem:[#allocation7 + $0x8c] ss:$16 sps:$4 sm:$0xff]   ;;  %v4314_v44 = vld [vmem:[#allocation7 + $0xe0] ss:$16 sps:$4 sm:$0xff]  }
 0x10e   :  { %1610 = vmatprep.subr.bf16.mxu1 %v4221_v45 }
 0x110   :  { %1449 = vmatpush1.bf16.msra.mxu0 %v4216_v46  ;;  %v4322_v46 = vld [vmem:[#allocation7 + $0x104] ss:$16 sps:$4 sm:$0xff]  }
 0x111   :  { %1611 = vmatpush1.bf16.msra.mxu1 %v4219_v47  ;;  %1450 = vmatprep.subr.bf16.mxu0 %v4224_v48  ;;  %v4299_v48 = vld [vmem:[#allocation7 + $0x88] ss:$16 sps:$4 sm:$0xff]  }
 0x112   :  { %1612 = vmatprep.subr.bf16.mxu1 %v4227_v49  ;;  %v4307_v49 = vld [vmem:[#allocation7 + $0xac] ss:$16 sps:$4 sm:$0xff]  }
 0x114   :  { %1451 = vmatpush1.bf16.msra.mxu0 %v4222_v50  ;;  %v4320_v50 = vld [vmem:[#allocation7 + $0x100] ss:$16 sps:$4 sm:$0xff]  }
 0x115   :  { %1613 = vmatpush1.bf16.msra.mxu1 %v4225_v51  ;;  %1452 = vmatprep.subr.bf16.mxu0 %v4230_v52  ;;  %v4328_v51 = vld [vmem:[#allocation7 + $0x124] ss:$16 sps:$4 sm:$0xff]   ;;  %v4305_v52 = vld [vmem:[#allocation7 + $0xa8] ss:$16 sps:$4 sm:$0xff]  }
 0x116   :  { %1614 = vmatprep.subr.bf16.mxu1 %v4233_v53  ;;  %v4313_v53 = vld [vmem:[#allocation7 + $0xcc] ss:$16 sps:$4 sm:$0xff]  }
 0x118   :  { %1453 = vmatpush1.bf16.msra.mxu0 %v4228_v54  ;;  %v4326_v54 = vld [vmem:[#allocation7 + $0x120] ss:$16 sps:$4 sm:$0xff]  }
 0x119   :  { %1615 = vmatpush1.bf16.msra.mxu1 %v4231_v55  ;;  %1454 = vmatprep.subr.bf16.mxu0 %v4236_v56  ;;  %v4334_v55 = vld [vmem:[#allocation7 + $0x144] ss:$16 sps:$4 sm:$0xff]   ;;  %v4311_v56 = vld [vmem:[#allocation7 + $0xc8] ss:$16 sps:$4 sm:$0xff]  }
 0x11a   :  { %1616 = vmatprep.subr.bf16.mxu1 %v4239_v57  ;;  %v4319_v57 = vld [vmem:[#allocation7 + $0xec] ss:$16 sps:$4 sm:$0xff]  }
 0x11c   :  { %1455 = vmatpush1.bf16.msra.mxu0 %v4234_v58  ;;  %v4332_v58 = vld [vmem:[#allocation7 + $0x140] ss:$16 sps:$4 sm:$0xff]  }
 0x11d   :  { %1617 = vmatpush1.bf16.msra.mxu1 %v4237_v59  ;;  %1456 = vmatprep.subr.bf16.mxu0 %v4242_v60  ;;  %v4340_v59 = vld [vmem:[#allocation7 + $0x164] ss:$16 sps:$4 sm:$0xff]   ;;  %v4317_v60 = vld [vmem:[#allocation7 + $0xe8] ss:$16 sps:$4 sm:$0xff]  }
 0x11e   :  { %1618 = vmatprep.subr.bf16.mxu1 %v4245_v61  ;;  %v4325_v61 = vld [vmem:[#allocation7 + $0x10c] ss:$16 sps:$4 sm:$0xff]  }
 0x120   :  { %1457 = vmatpush1.bf16.msra.mxu0 %v4240_v62  ;;  %v4338_v62 = vld [vmem:[#allocation7 + $0x160] ss:$16 sps:$4 sm:$0xff]  }
 0x121   :  { %1619 = vmatpush1.bf16.msra.mxu1 %v4243_v63  ;;  %1458 = vmatprep.subr.bf16.mxu0 %v4248_v1  ;;  %v4346_v63 = vld [vmem:[#allocation7 + $0x184] ss:$16 sps:$4 sm:$0xff]   ;;  %v4323_v1 = vld [vmem:[#allocation7 + $0x108] ss:$16 sps:$4 sm:$0xff]  }
 0x122   :  { %1620 = vmatprep.subr.bf16.mxu1 %v4251_v2  ;;  %v4331_v2 = vld [vmem:[#allocation7 + $0x12c] ss:$16 sps:$4 sm:$0xff]  }
 0x124   :  { %1459 = vmatpush1.bf16.msra.mxu0 %v4246_v3  ;;  %v4344_v3 = vld [vmem:[#allocation7 + $0x180] ss:$16 sps:$4 sm:$0xff]  }
 0x125   :  { %1621 = vmatpush1.bf16.msra.mxu1 %v4249_v4  ;;  %1460 = vmatprep.subr.bf16.mxu0 %v4254_v5  ;;  %v4352_v4 = vld [vmem:[#allocation7 + $0x1a4] ss:$16 sps:$4 sm:$0xff]   ;;  %v4329_v5 = vld [vmem:[#allocation7 + $0x128] ss:$16 sps:$4 sm:$0xff]  }
 0x126   :  { %1622 = vmatprep.subr.bf16.mxu1 %v4257_v6  ;;  %v4337_v6 = vld [vmem:[#allocation7 + $0x14c] ss:$16 sps:$4 sm:$0xff]  }
 0x128   :  { %1461 = vmatpush1.bf16.msra.mxu0 %v4252_v7  ;;  %v4350_v7 = vld [vmem:[#allocation7 + $0x1a0] ss:$16 sps:$4 sm:$0xff]  }
 0x129   :  { %1623 = vmatpush1.bf16.msra.mxu1 %v4255_v8  ;;  %1462 = vmatprep.subr.bf16.mxu0 %v4260_v9  ;;  %v4335_v8 = vld [vmem:[#allocation7 + $0x148] ss:$16 sps:$4 sm:$0xff]   ;;  %v4343_v9 = vld [vmem:[#allocation7 + $0x16c] ss:$16 sps:$4 sm:$0xff]  }
 0x12a   :  { %1624 = vmatprep.subr.bf16.mxu1 %v4263_v10  ;;  %v4341_v10 = vld [vmem:[#allocation7 + $0x168] ss:$16 sps:$4 sm:$0xff]  }
 0x12c   :  { %1463 = vmatpush1.bf16.msra.mxu0 %v4258_v11  ;;  %v4349_v11 = vld [vmem:[#allocation7 + $0x18c] ss:$16 sps:$4 sm:$0xff]  }
 0x12d   :  { %1625 = vmatpush1.bf16.msra.mxu1 %v4261_v12  ;;  %2476 = vmatprep.subr.bf16.mxu0 %v4274_v14  ;;  %v4347_v12 = vld [vmem:[#allocation7 + $0x188] ss:$16 sps:$4 sm:$0xff]  }
 0x12e   :  { %1626 = vmatprep.subr.bf16.mxu1 %v4268_v13  ;;  %v4355_v13 = vld [vmem:[#allocation7 + $0x1ac] ss:$16 sps:$4 sm:$0xff]   ;;  %v4353_v14 = vld [vmem:[#allocation7 + $0x1a8] ss:$16 sps:$4 sm:$0xff]  }
 0x12f   :  { %1465 = vmatmul.mubr.bf16.vlgmr.msra.gmra.mrb[0].mxu0 %v3441_v18 }
 0x130   :  { %2477 = vmatpush1.bf16.msra.mxu0 %v4272_v17  ;;  %v4361_v17 = vld [vmem:[#allocation7 + $0x1cc] ss:$16 sps:$4 sm:$0xff]  }
 0x131   :  { %1627 = vmatpush1.bf16.msra.mxu1 %v4266_v15  ;;  %2478 = vmatprep.subr.bf16.mxu0 %v4280_v20  ;;  %v4358_v15 = vld [vmem:[#allocation7 + $0x1c4] ss:$16 sps:$4 sm:$0xff]  }
 0x132   :  { %1637 = vmatprep.subr.bf16.mxu1 %v4271_v19  ;;  %v4359_v19 = vld [vmem:[#allocation7 + $0x1c8] ss:$16 sps:$4 sm:$0xff]   ;;  %v4364_v20 = vld [vmem:[#allocation7 + $0x1e4] ss:$16 sps:$4 sm:$0xff]  }
 0x134   :  { %1629 = vmatmul.mubr.bf16.vlgmr.msra.gmra.mrb[4].mxu1 %v3441_v18  ;;  %2479 = vmatpush1.bf16.msra.mxu0 %v4278_v23  ;;  %v4356_v18 = vld [vmem:[#allocation7 + $0x1c0] ss:$16 sps:$4 sm:$0xff]   ;;  %v4365_v23 = vld [vmem:[#allocation7 + $0x1e8] ss:$16 sps:$4 sm:$0xff]  }
 0x135   :  { %1638 = vmatpush1.bf16.msra.mxu1 %v4269_v21  ;;  %1669 = vmatprep.mubr.bf16.mxu1 %v4761_v0  ;;  %v4302_v0 = vld [vmem:[#allocation7 + $0xa0] ss:$16 sps:$4 sm:$0xff]   ;;  %v4367_v21 = vld [vmem:[#allocation7 + $0x1ec] ss:$16 sps:$4 sm:$0xff]  }
 0x136   :  { %2558 = vmatprep.subr.bf16.mxu1 %v4277_v22  ;;  %2480 = vmatprep.subr.bf16.mxu0 %v4286_v24  ;;  %v4362_v22 = vld [vmem:[#allocation7 + $0x1e0] ss:$16 sps:$4 sm:$0xff]   ;;  %v4370_v24 = vld [vmem:[#allocation7 + $0x204] ss:$16 sps:$4 sm:$0xff]  }
 0x138   :  { %2481 = vmatpush1.bf16.msra.mxu0 %v4284_v25  ;;  %v4373_v25 = vld [vmem:[#allocation7 + $0x20c] ss:$16 sps:$4 sm:$0xff]  }
 0x139   :  { %2482 = vmatprep.subr.bf16.mxu0 %v4292_v16  ;;  %v322_v16 = vlaneseq }
 0x13c   :  { %2483 = vmatpush1.bf16.msra.mxu0 %v4290_v26  ;;  %v4930_v26 = vshrl.u32 %v322_v16, 7  ;;  %v4422_v16 = vld [vmem:[#allocation7 + $0x320] ss:$16 sps:$4 sm:$0xff]  }
 0x13d   :  { %2484 = vmatprep.subr.bf16.mxu0 %v4298_v27 }
 0x13e   :  { %v4933_v27 = vsub.s32 0, %v4930_v26 }
 0x140   :  { %3641 = vmatmul.mubr.msk.bf16.vlgmr.msra.gmra.mrb[4].mxu1 %vm1346_vm0, %v4584_v33  ;;  %2485 = vmatpush1.bf16.msra.mxu0 %v4296_v30 }
 0x141   :  { %2559 = vmatpush1.bf16.msra.mxu1 %v4275_v28  ;;  %2486 = vmatprep.subr.bf16.mxu0 %v4304_v31  ;;  %v4938_v28 = vld [vmem:[%s5003_s2] sm:$0xf] }
 0x142   :  { %2560 = vmatprep.subr.bf16.mxu1 %v4283_v29  ;;  %v4941_v29 = vsub.s32 1, %v4930_v26  ;;  %v325_v30 = vrot.slane %v4938_v28, %v4933_v27 }
 0x144   :  { %2487 = vmatpush1.bf16.msra.mxu0 %v4302_v0  ;;  %v329_v31 = vrot.slane %v4938_v28, %v4941_v29 }
 0x145   :  { %2561 = vmatpush1.bf16.msra.mxu1 %v4281_v32  ;;  %2488 = vmatprep.subr.bf16.mxu0 %v4310_v35 }
 0x146   :  { %2562 = vmatprep.subr.bf16.mxu1 %v4289_v34 }
 0x147   :  { %v4926_v40 = vpop.f32.mrb[0].mxu1 }
 0x148   :  { %v4928_v42 = vpop.f32.mrb[1].mxu1  ;;  %2489 = vmatpush1.bf16.msra.mxu0 %v4308_v38 }
 0x149   :  { %v1511_v45 = vpop.f32.mrb[2].mxu1  ;;  %2563 = vmatpush1.bf16.msra.mxu1 %v4287_v36  ;;  %2490 = vmatprep.subr.bf16.mxu0 %v4316_v39 }
 0x14a   :  { %v1512_v47 = vpop.f32.mrb[3].mxu1  ;;  %2564 = vmatprep.subr.bf16.mxu1 %v4295_v37  ;;  %v4371_v45 = vld [vmem:[#allocation7 + $0x208] ss:$16 sps:$4 sm:$0xff]  }
 0x14b   :  { %v4376_v47 = vld [vmem:[#allocation7 + $0x224] ss:$16 sps:$4 sm:$0xff]  }
 0x14c   :  { %2491 = vmatpush1.bf16.msra.mxu0 %v4314_v44  ;;  %v4368_v44 = vld [vmem:[#allocation7 + $0x200] ss:$16 sps:$4 sm:$0xff]  }
 0x14d   :  { %2565 = vmatpush1.bf16.msra.mxu1 %v4293_v41  ;;  %2492 = vmatprep.subr.bf16.mxu0 %v4322_v46 }
 0x14e   :  { %2566 = vmatprep.subr.bf16.mxu1 %v4301_v43 }
 0x150   :  { %2493 = vmatpush1.bf16.msra.mxu0 %v4320_v50  ;;  %v4377_v50 = vld [vmem:[#allocation7 + $0x228] ss:$16 sps:$4 sm:$0xff]  }
 0x151   :  { %2567 = vmatpush1.bf16.msra.mxu1 %v4299_v48  ;;  %2494 = vmatprep.subr.bf16.mxu0 %v4328_v51  ;;  %v4379_v48 = vld [vmem:[#allocation7 + $0x22c] ss:$16 sps:$4 sm:$0xff]  }
 0x152   :  { %2568 = vmatprep.subr.bf16.mxu1 %v4307_v49  ;;  %v336_v49 = vsub.s32 3, %v4930_v26  ;;  %v4385_v51 = vld [vmem:[#allocation7 + $0x24c] ss:$16 sps:$4 sm:$0xff]  }
 0x154   :  { %2495 = vmatpush1.bf16.msra.mxu0 %v4326_v54  ;;  %v4380_v54 = vld [vmem:[#allocation7 + $0x240] ss:$16 sps:$4 sm:$0xff]  }
 0x155   :  { %2569 = vmatpush1.bf16.msra.mxu1 %v4305_v52  ;;  %2496 = vmatprep.subr.bf16.mxu0 %v4334_v55  ;;  %v337_v52 = vrot.slane %v4938_v28, %v336_v49  ;;  %v4383_v55 = vld [vmem:[#allocation7 + $0x248] ss:$16 sps:$4 sm:$0xff]  }
 0x156   :  { %2570 = vmatprep.subr.bf16.mxu1 %v4313_v53 }
 0x158   :  { %2497 = vmatpush1.bf16.msra.mxu0 %v4332_v58  ;;  %v4391_v58 = vld [vmem:[#allocation7 + $0x26c] ss:$16 sps:$4 sm:$0xff]  }
 0x159   :  { %2571 = vmatpush1.bf16.msra.mxu1 %v4311_v56  ;;  %2498 = vmatprep.subr.bf16.mxu0 %v4340_v59 }
 0x15a   :  { %2572 = vmatprep.subr.bf16.mxu1 %v4319_v57  ;;  %v4388_v57 = vld [vmem:[#allocation7 + $0x264] ss:$16 sps:$4 sm:$0xff]  }
 0x15c   :  { %2499 = vmatpush1.bf16.msra.mxu0 %v4338_v62 }
 0x15d   :  { %2573 = vmatpush1.bf16.msra.mxu1 %v4317_v60  ;;  %2500 = vmatprep.subr.bf16.mxu0 %v4346_v63  ;;  %v4386_v63 = vld [vmem:[#allocation7 + $0x260] ss:$16 sps:$4 sm:$0xff]  }
 0x15e   :  { %2574 = vmatprep.subr.bf16.mxu1 %v4325_v61 }
 0x160   :  { %2501 = vmatpush1.bf16.msra.mxu0 %v4344_v3  ;;  %v4394_v3 = vld [vmem:[#allocation7 + $0x284] ss:$16 sps:$4 sm:$0xff]  }
 0x161   :  { %2575 = vmatpush1.bf16.msra.mxu1 %v4323_v1  ;;  %2502 = vmatprep.subr.bf16.mxu0 %v4352_v4  ;;  %v4389_v1 = vld [vmem:[#allocation7 + $0x268] ss:$16 sps:$4 sm:$0xff]   ;;  %v4397_v4 = vld [vmem:[#allocation7 + $0x28c] ss:$16 sps:$4 sm:$0xff]  }
 0x162   :  { %2576 = vmatprep.subr.bf16.mxu1 %v4331_v2 }
 0x164   :  { %2503 = vmatpush1.bf16.msra.mxu0 %v4350_v7  ;;  %v4400_v7 = vld [vmem:[#allocation7 + $0x2a4] ss:$16 sps:$4 sm:$0xff]  }
 0x165   :  { %2577 = vmatpush1.bf16.msra.mxu1 %v4329_v5  ;;  %2504 = vmatprep.subr.bf16.mxu0 %v4358_v15  ;;  %v4392_v5 = vld [vmem:[#allocation7 + $0x280] ss:$16 sps:$4 sm:$0xff]   ;;  %v4412_v15 = vld [vmem:[#allocation7 + $0x2e4] ss:$16 sps:$4 sm:$0xff]  }
 0x166   :  { %2578 = vmatprep.subr.bf16.mxu1 %v4337_v6  ;;  %v4395_v6 = vld [vmem:[#allocation7 + $0x288] ss:$16 sps:$4 sm:$0xff]  }
 0x168   :  { %2505 = vmatpush1.bf16.msra.mxu0 %v4356_v18  ;;  %v4410_v18 = vld [vmem:[#allocation7 + $0x2e0] ss:$16 sps:$4 sm:$0xff]  }
 0x169   :  { %2579 = vmatpush1.bf16.msra.mxu1 %v4335_v8  ;;  %2506 = vmatprep.subr.bf16.mxu0 %v4364_v20  ;;  %v4403_v8 = vld [vmem:[#allocation7 + $0x2ac] ss:$16 sps:$4 sm:$0xff]   ;;  %v4418_v20 = vld [vmem:[#allocation7 + $0x304] ss:$16 sps:$4 sm:$0xff]  }
 0x16a   :  { %2580 = vmatprep.subr.bf16.mxu1 %v4343_v9  ;;  %v4398_v9 = vld [vmem:[#allocation7 + $0x2a0] ss:$16 sps:$4 sm:$0xff]  }
 0x16c   :  { %2507 = vmatpush1.bf16.msra.mxu0 %v4362_v22  ;;  %v4416_v22 = vld [vmem:[#allocation7 + $0x300] ss:$16 sps:$4 sm:$0xff]  }
 0x16d   :  { %2581 = vmatpush1.bf16.msra.mxu1 %v4341_v10  ;;  %2517 = vmatprep.subr.bf16.mxu0 %v4370_v24  ;;  %v4401_v10 = vld [vmem:[#allocation7 + $0x2a8] ss:$16 sps:$4 sm:$0xff]   ;;  %v4424_v24 = vld [vmem:[#allocation7 + $0x324] ss:$16 sps:$4 sm:$0xff]  }
 0x16e   :  { %2582 = vmatprep.subr.bf16.mxu1 %v4349_v11  ;;  %v4406_v11 = vld [vmem:[#allocation7 + $0x2c4] ss:$16 sps:$4 sm:$0xff]  }
 0x171   :  { %2583 = vmatpush1.bf16.msra.mxu1 %v4347_v12  ;;  %v4409_v12 = vld [vmem:[#allocation7 + $0x2cc] ss:$16 sps:$4 sm:$0xff]  }
 0x172   :  { %2584 = vmatprep.subr.bf16.mxu1 %v4355_v13  ;;  %v4404_v13 = vld [vmem:[#allocation7 + $0x2c0] ss:$16 sps:$4 sm:$0xff]  }
 0x175   :  { %2585 = vmatpush1.bf16.msra.mxu1 %v4353_v14  ;;  %v4407_v14 = vld [vmem:[#allocation7 + $0x2c8] ss:$16 sps:$4 sm:$0xff]  }
 0x176   :  { %2586 = vmatprep.subr.bf16.mxu1 %v4361_v17  ;;  %v4415_v17 = vld [vmem:[#allocation7 + $0x2ec] ss:$16 sps:$4 sm:$0xff]  }
 0x179   :  { %2587 = vmatpush1.bf16.msra.mxu1 %v4359_v19  ;;  %v4413_v19 = vld [vmem:[#allocation7 + $0x2e8] ss:$16 sps:$4 sm:$0xff]  }
 0x17a   :  { %2588 = vmatprep.subr.bf16.mxu1 %v4367_v21  ;;  %v4421_v21 = vld [vmem:[#allocation7 + $0x30c] ss:$16 sps:$4 sm:$0xff]  }
 0x17d   :  { %2589 = vmatpush1.bf16.msra.mxu1 %v4365_v23  ;;  %v4419_v23 = vld [vmem:[#allocation7 + $0x308] ss:$16 sps:$4 sm:$0xff]  }
 0x17e   :  { %2599 = vmatprep.subr.bf16.mxu1 %v4373_v25  ;;  %v4427_v25 = vld [vmem:[#allocation7 + $0x32c] ss:$16 sps:$4 sm:$0xff]  }
 0x202   :  { %v1466_v32 = vpop.f32.mrb[0].mxu0 }
 0x203   :  { %v3911_v33 = vadd.f32 %v1466_v32, %v325_v30  ;;  %v1468_v34 = vpop.f32.mrb[1].mxu0  ;;  %v4425_v30 = vld [vmem:[#allocation7 + $0x328] ss:$16 sps:$4 sm:$0xff]   ;;  %v4433_v32 = vld [vmem:[#allocation7 + $0x34c] ss:$16 sps:$4 sm:$0xff]  }
 0x204   :  { %v3913_v0 = vadd.f32 %v1468_v34, %v329_v31  ;;  %v1470_v35 = vpop.f32.mrb[2].mxu0  ;;  %v4430_v31 = vld [vmem:[#allocation7 + $0x344] ss:$16 sps:$4 sm:$0xff]   ;;  %v4431_v34 = vld [vmem:[#allocation7 + $0x348] ss:$16 sps:$4 sm:$0xff]  }
 0x205   :  { %v3912_v36 = vadd.f32 %v3911_v33, %v4926_v40  ;;  %v1471_v37 = vpop.f32.mrb[3].mxu0  ;;  %v4374_v40 = vld [vmem:[#allocation7 + $0x220] ss:$16 sps:$4 sm:$0xff]   ;;  %v4439_v35 = vld [vmem:[#allocation7 + $0x36c] ss:$16 sps:$4 sm:$0xff]  }
 0x206   :  { %v3914_v38 = vadd.f32 %v3913_v0, %v4928_v42  ;;  %v4382_v42 = vld [vmem:[#allocation7 + $0x244] ss:$16 sps:$4 sm:$0xff]   ;;  %v4428_v33 = vld [vmem:[#allocation7 + $0x340] ss:$16 sps:$4 sm:$0xff]   ;;  %v4437_v37 = vld [vmem:[#allocation7 + $0x368] ss:$16 sps:$4 sm:$0xff]  }
 0x207   :  { %v1678_v39 = vmax.f32 %v3912_v36, 0.0  ;;  %v4436_v0 = vld [vmem:[#allocation7 + $0x364] ss:$16 sps:$4 sm:$0xff]   ;;  %v4434_v36 = vld [vmem:[#allocation7 + $0x360] ss:$16 sps:$4 sm:$0xff]  }
 0x208   :  { %v1679_v41 = vmax.f32 %v3914_v38, 0.0  ;;  %v4442_v38 = vld [vmem:[#allocation7 + $0x384] ss:$16 sps:$4 sm:$0xff]  }
 0x209   :  { %v1682_v46 = vpack.c.bf16 %v1678_v39, %v1678_v39  ;;  %v4445_v39 = vld [vmem:[#allocation7 + $0x38c] ss:$16 sps:$4 sm:$0xff]  }
 0x20a   :  { %v1683_v43 = vpack.c.bf16 %v1679_v41, %v1679_v41  ;;  %v4440_v41 = vld [vmem:[#allocation7 + $0x380] ss:$16 sps:$4 sm:$0xff]  }
 0x20c   :  { %2508 = vmatprep.mubr.bf16.mxu0 %v1683_v43  ;;  %2590 = vmatprep.mubr.bf16.mxu1 %v1683_v43  ;;  %v4443_v43 = vld [vmem:[#allocation7 + $0x388] ss:$16 sps:$4 sm:$0xff]  }
 0x20d   :  { %2509 = vmatmul.mubr.bf16.vlgmr.msra.gmra.mrb[4].mxu0 %v1682_v46  ;;  %2591 = vmatmul.mubr.bf16.vlgmr.msra.gmra.mrb[8].mxu1 %v1682_v46  ;;  %v4451_v46 = vld [vmem:[#allocation7 + $0x3ac] ss:$16 sps:$4 sm:$0xff]  }
 0x20e   :  { %2518 = vmatpush1.bf16.msra.mxu0 %v4368_v44  ;;  %2600 = vmatpush1.bf16.msra.mxu1 %v4371_v45  ;;  %v332_v44 = vsub.s32 2, %v4930_v26  ;;  %v4448_v45 = vld [vmem:[#allocation7 + $0x3a4] ss:$16 sps:$4 sm:$0xff]   ;;  %v4574_v26 = vld [vmem:[#allocation10 + $0x78] sm:$0xff]  }
 0x20f   :  { %2519 = vmatprep.subr.bf16.mxu0 %v4376_v47  ;;  %2601 = vmatprep.subr.bf16.mxu1 %v4379_v48  ;;  %v4446_v47 = vld [vmem:[#allocation7 + $0x3a0] ss:$16 sps:$4 sm:$0xff]   ;;  %v4449_v48 = vld [vmem:[#allocation7 + $0x3a8] ss:$16 sps:$4 sm:$0xff]  }
 0x212   :  { %2520 = vmatpush1.bf16.msra.mxu0 %v4374_v40  ;;  %2602 = vmatpush1.bf16.msra.mxu1 %v4377_v50  ;;  %v333_v40 = vrot.slane %v4938_v28, %v332_v44  ;;  %v4454_v50 = vld [vmem:[#allocation7 + $0x3c4] ss:$16 sps:$4 sm:$0xff]  }
 0x213   :  { %v4953_v53 = vpop.f32.mrb[4].mxu1  ;;  %2521 = vmatprep.subr.bf16.mxu0 %v4382_v42  ;;  %2603 = vmatprep.subr.bf16.mxu1 %v4385_v51  ;;  %v4457_v42 = vld [vmem:[#allocation7 + $0x3cc] ss:$16 sps:$4 sm:$0xff]   ;;  %v4452_v51 = vld [vmem:[#allocation7 + $0x3c0] ss:$16 sps:$4 sm:$0xff]  }
 0x214   :  { %v1673_v56 = vpop.f32.mrb[5].mxu1  ;;  %v4466_v28 = vld [vmem:[#allocation8 + $0x4] ss:$8 sps:$4 sm:$0xff]  }
 0x215   :  { %v3916_v59 = vadd.f32 %v1673_v56, %v337_v52  ;;  %v1675_v60 = vpop.f32.mrb[6].mxu1  ;;  %v4455_v52 = vld [vmem:[#allocation7 + $0x3c8] ss:$16 sps:$4 sm:$0xff]   ;;  %v4463_v56 = vld [vmem:[#allocation7 + $0x3ec] ss:$16 sps:$4 sm:$0xff]  }
 0x216   :  { %v1676_v61 = vpop.f32.mrb[7].mxu1  ;;  %2522 = vmatpush1.bf16.msra.mxu0 %v4380_v54  ;;  %2604 = vmatpush1.bf16.msra.mxu1 %v4383_v55  ;;  %v3915_v54 = vadd.f32 %v4953_v53, %v333_v40  ;;  %v4460_v55 = vld [vmem:[#allocation7 + $0x3e4] ss:$16 sps:$4 sm:$0xff]   ;;  %v4464_v60 = vld [vmem:[#allocation8] ss:$8 sps:$4 sm:$0xff]  }
 0x217   :  { %v1681_v62 = vmax.f32 %v3916_v59, 0.0  ;;  %2523 = vmatprep.subr.bf16.mxu0 %v4388_v57  ;;  %2605 = vmatprep.subr.bf16.mxu1 %v4391_v58  ;;  %v4458_v57 = vld [vmem:[#allocation7 + $0x3e0] ss:$16 sps:$4 sm:$0xff]   ;;  %v4461_v58 = vld [vmem:[#allocation7 + $0x3e8] ss:$16 sps:$4 sm:$0xff]  }
 0x218   :  { %v1680_v59 = vmax.f32 %v3915_v54, 0.0  ;;  %v4467_v53 = vld [vmem:[#allocation8 + $0x10] ss:$8 sps:$4 sm:$0xff]  }
 0x219   :  { %v1685_v2 = vpack.c.bf16 %v1681_v62, %v1681_v62  ;;  %v4469_v62 = vld [vmem:[#allocation8 + $0x14] ss:$8 sps:$4 sm:$0xff]  }
 0x21a   :  { %2524 = vmatpush1.bf16.msra.mxu0 %v4386_v63  ;;  %2606 = vmatpush1.bf16.msra.mxu1 %v4389_v1  ;;  %v1684_v61 = vpack.c.bf16 %v1680_v59, %v1680_v59  ;;  %v4472_v63 = vld [vmem:[#allocation8 + $0x24] ss:$8 sps:$4 sm:$0xff]   ;;  %v4470_v1 = vld [vmem:[#allocation8 + $0x20] ss:$8 sps:$4 sm:$0xff]  }
 0x21b   :  { %2549 = vmatprep.mubr.bf16.mxu0 %v1685_v2  ;;  %2631 = vmatprep.mubr.bf16.mxu1 %v1685_v2  ;;  %v4475_v2 = vld [vmem:[#allocation8 + $0x34] ss:$8 sps:$4 sm:$0xff]  }
 0x21c   :  { %2525 = vmatprep.subr.bf16.mxu0 %v4394_v3  ;;  %2607 = vmatprep.subr.bf16.mxu1 %v4397_v4  ;;  %v4473_v3 = vld [vmem:[#allocation8 + $0x30] ss:$8 sps:$4 sm:$0xff]   ;;  %v4478_v4 = vld [vmem:[#allocation8 + $0x44] ss:$8 sps:$4 sm:$0xff]  }
 0x21e   :  { %2526 = vmatpush1.bf16.msra.mxu0 %v4392_v5  ;;  %2608 = vmatpush1.bf16.msra.mxu1 %v4395_v6  ;;  %v4476_v5 = vld [vmem:[#allocation8 + $0x40] ss:$8 sps:$4 sm:$0xff]   ;;  %v4481_v6 = vld [vmem:[#allocation8 + $0x54] ss:$8 sps:$4 sm:$0xff]  }
 0x21f   :  { %2527 = vmatprep.subr.bf16.mxu0 %v4400_v7  ;;  %2609 = vmatprep.subr.bf16.mxu1 %v4403_v8  ;;  %v4479_v7 = vld [vmem:[#allocation8 + $0x50] ss:$8 sps:$4 sm:$0xff]   ;;  %v4484_v8 = vld [vmem:[#allocation8 + $0x64] ss:$8 sps:$4 sm:$0xff]  }
 0x222   :  { %2528 = vmatpush1.bf16.msra.mxu0 %v4398_v9  ;;  %2610 = vmatpush1.bf16.msra.mxu1 %v4401_v10  ;;  %v4482_v9 = vld [vmem:[#allocation8 + $0x60] ss:$8 sps:$4 sm:$0xff]   ;;  %v4487_v10 = vld [vmem:[#allocation8 + $0x74] ss:$8 sps:$4 sm:$0xff]  }
 0x223   :  { %2529 = vmatprep.subr.bf16.mxu0 %v4406_v11  ;;  %2611 = vmatprep.subr.bf16.mxu1 %v4409_v12  ;;  %v4485_v11 = vld [vmem:[#allocation8 + $0x70] ss:$8 sps:$4 sm:$0xff]   ;;  %v4490_v12 = vld [vmem:[#allocation8 + $0x84] ss:$8 sps:$4 sm:$0xff]  }
 0x226   :  { %2530 = vmatpush1.bf16.msra.mxu0 %v4404_v13  ;;  %2612 = vmatpush1.bf16.msra.mxu1 %v4407_v14  ;;  %v4488_v13 = vld [vmem:[#allocation8 + $0x80] ss:$8 sps:$4 sm:$0xff]   ;;  %v4493_v14 = vld [vmem:[#allocation8 + $0x94] ss:$8 sps:$4 sm:$0xff]  }
 0x227   :  { %2531 = vmatprep.subr.bf16.mxu0 %v4412_v15  ;;  %2613 = vmatprep.subr.bf16.mxu1 %v4415_v17  ;;  %v4491_v15 = vld [vmem:[#allocation8 + $0x90] ss:$8 sps:$4 sm:$0xff]   ;;  %v4496_v17 = vld [vmem:[#allocation8 + $0xa4] ss:$8 sps:$4 sm:$0xff]  }
 0x22a   :  { %2532 = vmatpush1.bf16.msra.mxu0 %v4410_v18  ;;  %2614 = vmatpush1.bf16.msra.mxu1 %v4413_v19  ;;  %v4494_v18 = vld [vmem:[#allocation8 + $0xa0] ss:$8 sps:$4 sm:$0xff]   ;;  %v4499_v19 = vld [vmem:[#allocation8 + $0xb4] ss:$8 sps:$4 sm:$0xff]  }
 0x22b   :  { %2533 = vmatprep.subr.bf16.mxu0 %v4418_v20  ;;  %2615 = vmatprep.subr.bf16.mxu1 %v4421_v21  ;;  %v4497_v20 = vld [vmem:[#allocation8 + $0xb0] ss:$8 sps:$4 sm:$0xff]   ;;  %v4502_v21 = vld [vmem:[#allocation8 + $0xc4] ss:$8 sps:$4 sm:$0xff]  }
 0x22e   :  { %2534 = vmatpush1.bf16.msra.mxu0 %v4416_v22  ;;  %2616 = vmatpush1.bf16.msra.mxu1 %v4419_v23  ;;  %v4500_v22 = vld [vmem:[#allocation8 + $0xc0] ss:$8 sps:$4 sm:$0xff]   ;;  %v4505_v23 = vld [vmem:[#allocation8 + $0xd4] ss:$8 sps:$4 sm:$0xff]  }
 0x22f   :  { %2535 = vmatprep.subr.bf16.mxu0 %v4424_v24  ;;  %2617 = vmatprep.subr.bf16.mxu1 %v4427_v25  ;;  %v4503_v24 = vld [vmem:[#allocation8 + $0xd0] ss:$8 sps:$4 sm:$0xff]   ;;  %v4508_v25 = vld [vmem:[#allocation8 + $0xe4] ss:$8 sps:$4 sm:$0xff]  }
 0x232   :  { %2536 = vmatpush1.bf16.msra.mxu0 %v4422_v16  ;;  %2618 = vmatpush1.bf16.msra.mxu1 %v4425_v30  ;;  %v4506_v16 = vld [vmem:[#allocation8 + $0xe0] ss:$8 sps:$4 sm:$0xff]   ;;  %v4511_v30 = vld [vmem:[#allocation8 + $0xf4] ss:$8 sps:$4 sm:$0xff]  }
 0x233   :  { %2537 = vmatprep.subr.bf16.mxu0 %v4430_v31  ;;  %2619 = vmatprep.subr.bf16.mxu1 %v4433_v32  ;;  %v4509_v31 = vld [vmem:[#allocation8 + $0xf0] ss:$8 sps:$4 sm:$0xff]   ;;  %v4514_v32 = vld [vmem:[#allocation8 + $0x104] ss:$8 sps:$4 sm:$0xff]  }
 0x236   :  { %2538 = vmatpush1.bf16.msra.mxu0 %v4428_v33  ;;  %2620 = vmatpush1.bf16.msra.mxu1 %v4431_v34  ;;  %v4560_v33 = vld [vmem:[#allocation10 + $0x40] sm:$0xff]  }
 0x237   :  { %2539 = vmatprep.subr.bf16.mxu0 %v4436_v0  ;;  %2621 = vmatprep.subr.bf16.mxu1 %v4439_v35  ;;  %v4561_v34 = vld [vmem:[#allocation10] sm:$0xff]   ;;  %v4562_v0 = vld [vmem:[#allocation10 + $0x48] sm:$0xff]  }
 0x238   :  { %v4563_v35 = vld [vmem:[#allocation10 + $0x8] sm:$0xff]  }
 0x23a   :  { %2540 = vmatpush1.bf16.msra.mxu0 %v4434_v36  ;;  %2622 = vmatpush1.bf16.msra.mxu1 %v4437_v37  ;;  %v4564_v36 = vld [vmem:[#allocation10 + $0x50] sm:$0xff]  }
 0x23b   :  { %2541 = vmatprep.subr.bf16.mxu0 %v4442_v38  ;;  %2623 = vmatprep.subr.bf16.mxu1 %v4445_v39  ;;  %v4565_v37 = vld [vmem:[#allocation10 + $0x10] sm:$0xff]   ;;  %v4566_v38 = vld [vmem:[#allocation10 + $0x58] sm:$0xff]  }
 0x23c   :  { %v4567_v39 = vld [vmem:[#allocation10 + $0x18] sm:$0xff]  }
 0x23e   :  { %2542 = vmatpush1.bf16.msra.mxu0 %v4440_v41  ;;  %2624 = vmatpush1.bf16.msra.mxu1 %v4443_v43  ;;  %v4568_v41 = vld [vmem:[#allocation10 + $0x60] sm:$0xff]  }
 0x23f   :  { %2543 = vmatprep.subr.bf16.mxu0 %v4448_v45  ;;  %2625 = vmatprep.subr.bf16.mxu1 %v4451_v46  ;;  %v4569_v43 = vld [vmem:[#allocation10 + $0x20] sm:$0xff]   ;;  %v4570_v45 = vld [vmem:[#allocation10 + $0x68] sm:$0xff]  }
 0x240   :  { %v4571_v46 = vld [vmem:[#allocation10 + $0x28] sm:$0xff]  }
 0x242   :  { %2544 = vmatpush1.bf16.msra.mxu0 %v4446_v47  ;;  %2626 = vmatpush1.bf16.msra.mxu1 %v4449_v48  ;;  %v4963_v47 = vld [vmem:[%s5005_s4] sm:$0xf] }
 0x243   :  { %2545 = vmatprep.subr.bf16.mxu0 %v4454_v50  ;;  %2627 = vmatprep.subr.bf16.mxu1 %v4457_v42  ;;  %v1819_v48 = vrot.slane %v4963_v47, %v4933_v27  ;;  %v1823_v40 = vrot.slane %v4963_v47, %v4941_v29  ;;  %v1831_v50 = vrot.slane %v4963_v47, %v336_v49 }
 0x246   :  { %2546 = vmatpush1.bf16.msra.mxu0 %v4452_v51  ;;  %2628 = vmatpush1.bf16.msra.mxu1 %v4455_v52 }
 0x247   :  { %2547 = vmatprep.subr.bf16.mxu0 %v4460_v55  ;;  %2629 = vmatprep.subr.bf16.mxu1 %v4463_v56 }
 0x24a   :  { %2548 = vmatpush1.bf16.msra.mxu0 %v4458_v57  ;;  %2630 = vmatpush1.bf16.msra.mxu1 %v4461_v58 }
 0x24b   :  { %3044 = vmatprep.subr.bf16.mxu0 %v4466_v28  ;;  %3860 = vmatprep.subr.bf16.mxu1 %v4560_v33  ;;  %v1827_v33 = vrot.slane %v4963_v47, %v332_v44  ;;  %v4575_v44 = vld [vmem:[#allocation10 + $0x38] sm:$0xff]  }
 0x24d   :  { %2550 = vmatmul.mubr.bf16.vlgmr.msra.gmra.mrb[4].mxu0 %v1684_v61  ;;  %2632 = vmatmul.mubr.bf16.vlgmr.msra.gmra.mrb[8].mxu1 %v1684_v61 }
 0x24e   :  { %3045 = vmatpush1.bf16.msra.mxu0 %v4464_v60  ;;  %3861 = vmatpush3.bf16.msra.mxu1 %v4561_v34  ;;  %v4556_v34 = vld [vmem:[#allocation8 + $0x1e4] ss:$8 sps:$4 sm:$0xff]  }
 0x24f   :  { %3046 = vmatprep.subr.bf16.mxu0 %v4469_v62  ;;  %3862 = vmatprep.subr.bf16.mxu1 %v4562_v0  ;;  %v4554_v0 = vld [vmem:[#allocation8 + $0x1e0] ss:$8 sps:$4 sm:$0xff]  }
 0x252   :  { %3047 = vmatpush1.bf16.msra.mxu0 %v4467_v53  ;;  %3863 = vmatpush3.bf16.msra.mxu1 %v4563_v35 }
 0x253   :  { %3048 = vmatprep.subr.bf16.mxu0 %v4472_v63  ;;  %3864 = vmatprep.subr.bf16.mxu1 %v4564_v36  ;;  %v4559_v36 = vld [vmem:[#allocation8 + $0x1f4] ss:$8 sps:$4 sm:$0xff]  }
 0x256   :  { %3049 = vmatpush1.bf16.msra.mxu0 %v4470_v1  ;;  %3865 = vmatpush3.bf16.msra.mxu1 %v4565_v37  ;;  %v4512_v1 = vld [vmem:[#allocation8 + $0x100] ss:$8 sps:$4 sm:$0xff]   ;;  %v4557_v37 = vld [vmem:[#allocation8 + $0x1f0] ss:$8 sps:$4 sm:$0xff]  }
 0x257   :  { %3050 = vmatprep.subr.bf16.mxu0 %v4475_v2  ;;  %3866 = vmatprep.subr.bf16.mxu1 %v4566_v38 }
 0x25a   :  { %3051 = vmatpush1.bf16.msra.mxu0 %v4473_v3  ;;  %3867 = vmatpush3.bf16.msra.mxu1 %v4567_v39  ;;  %v4517_v3 = vld [vmem:[#allocation8 + $0x114] ss:$8 sps:$4 sm:$0xff]  }
 0x25b   :  { %3052 = vmatprep.subr.bf16.mxu0 %v4478_v4  ;;  %3868 = vmatprep.subr.bf16.mxu1 %v4568_v41  ;;  %v4515_v4 = vld [vmem:[#allocation8 + $0x110] ss:$8 sps:$4 sm:$0xff]  }
 0x25c   :  { %v4572_v41 = vld [vmem:[#allocation10 + $0x70] sm:$0xff]  }
 0x25e   :  { %3053 = vmatpush1.bf16.msra.mxu0 %v4476_v5  ;;  %3869 = vmatpush3.bf16.msra.mxu1 %v4569_v43  ;;  %v4520_v5 = vld [vmem:[#allocation8 + $0x124] ss:$8 sps:$4 sm:$0xff]   ;;  %v4573_v43 = vld [vmem:[#allocation10 + $0x30] sm:$0xff]  }
 0x25f   :  { %3054 = vmatprep.subr.bf16.mxu0 %v4481_v6  ;;  %3870 = vmatprep.subr.bf16.mxu1 %v4570_v45  ;;  %v4518_v6 = vld [vmem:[#allocation8 + $0x120] ss:$8 sps:$4 sm:$0xff]   ;;  %v4762_v45 = vmov 0.0  }
 0x262   :  { %3055 = vmatpush1.bf16.msra.mxu0 %v4479_v7  ;;  %3871 = vmatpush3.bf16.msra.mxu1 %v4571_v46  ;;  %v4523_v7 = vld [vmem:[#allocation8 + $0x134] ss:$8 sps:$4 sm:$0xff]   ;;  %v2712_v46 = vld [vmem:[%s5007_s6] sm:$0x3] }
 0x263   :  { %3056 = vmatprep.subr.bf16.mxu0 %v4484_v8  ;;  %v4521_v8 = vld [vmem:[#allocation8 + $0x130] ss:$8 sps:$4 sm:$0xff]   ;;  %3872 = vmatprep.subr.bf16.mxu1 %v4572_v41  ;;  %v2717_v47 = vrot.slane %v2712_v46, %v4933_v27 }
 0x264   :  { %v4578_v27 = vld [vmem:[#allocation11 + $0x10] sm:$0xff]  }
 0x266   :  { %3057 = vmatpush1.bf16.msra.mxu0 %v4482_v9  ;;  %v4526_v9 = vld [vmem:[#allocation8 + $0x144] ss:$8 sps:$4 sm:$0xff]   ;;  %3873 = vmatpush3.bf16.msra.mxu1 %v4573_v43 }
 0x267   :  { %3058 = vmatprep.subr.bf16.mxu0 %v4487_v10  ;;  %v4524_v10 = vld [vmem:[#allocation8 + $0x140] ss:$8 sps:$4 sm:$0xff]   ;;  %3874 = vmatprep.subr.bf16.mxu1 %v4574_v26 }
 0x26a   :  { %3059 = vmatpush1.bf16.msra.mxu0 %v4485_v11  ;;  %v4529_v11 = vld [vmem:[#allocation8 + $0x154] ss:$8 sps:$4 sm:$0xff]   ;;  %3875 = vmatpush3.bf16.msra.mxu1 %v4575_v44 }
 0x26b   :  { %3060 = vmatprep.subr.bf16.mxu0 %v4490_v12  ;;  %v4527_v12 = vld [vmem:[#allocation8 + $0x150] ss:$8 sps:$4 sm:$0xff]   ;;  %3891 = vmatprep.subr.bf16.mxu1 %v4762_v45 }
 0x26e   :  { %3061 = vmatpush1.bf16.msra.mxu0 %v4488_v13  ;;  %v4532_v13 = vld [vmem:[#allocation8 + $0x164] ss:$8 sps:$4 sm:$0xff]  }
 0x26f   :  { %3062 = vmatprep.subr.bf16.mxu0 %v4493_v14  ;;  %v4530_v14 = vld [vmem:[#allocation8 + $0x160] ss:$8 sps:$4 sm:$0xff]  }
 0x272   :  { %3063 = vmatpush1.bf16.msra.mxu0 %v4491_v15  ;;  %v4535_v15 = vld [vmem:[#allocation8 + $0x174] ss:$8 sps:$4 sm:$0xff]  }
 0x273   :  { %3064 = vmatprep.subr.bf16.mxu0 %v4496_v17  ;;  %v4533_v17 = vld [vmem:[#allocation8 + $0x170] ss:$8 sps:$4 sm:$0xff]  }
 0x276   :  { %3065 = vmatpush1.bf16.msra.mxu0 %v4494_v18  ;;  %v4538_v18 = vld [vmem:[#allocation8 + $0x184] ss:$8 sps:$4 sm:$0xff]  }
 0x277   :  { %3066 = vmatprep.subr.bf16.mxu0 %v4499_v19  ;;  %v4536_v19 = vld [vmem:[#allocation8 + $0x180] ss:$8 sps:$4 sm:$0xff]  }
 0x27a   :  { %3067 = vmatpush1.bf16.msra.mxu0 %v4497_v20  ;;  %v4541_v20 = vld [vmem:[#allocation8 + $0x194] ss:$8 sps:$4 sm:$0xff]  }
 0x27b   :  { %3068 = vmatprep.subr.bf16.mxu0 %v4502_v21  ;;  %v4539_v21 = vld [vmem:[#allocation8 + $0x190] ss:$8 sps:$4 sm:$0xff]  }
 0x27e   :  { %3069 = vmatpush1.bf16.msra.mxu0 %v4500_v22  ;;  %v4544_v22 = vld [vmem:[#allocation8 + $0x1a4] ss:$8 sps:$4 sm:$0xff]  }
 0x27f   :  { %3070 = vmatprep.subr.bf16.mxu0 %v4505_v23  ;;  %v4542_v23 = vld [vmem:[#allocation8 + $0x1a0] ss:$8 sps:$4 sm:$0xff]  }
 0x282   :  { %3071 = vmatpush1.bf16.msra.mxu0 %v4503_v24  ;;  %v4547_v24 = vld [vmem:[#allocation8 + $0x1b4] ss:$8 sps:$4 sm:$0xff]  }
 0x283   :  { %3072 = vmatprep.subr.bf16.mxu0 %v4508_v25  ;;  %v4545_v25 = vld [vmem:[#allocation8 + $0x1b0] ss:$8 sps:$4 sm:$0xff]  }
 0x286   :  { %3073 = vmatpush1.bf16.msra.mxu0 %v4506_v16  ;;  %v4550_v16 = vld [vmem:[#allocation8 + $0x1c4] ss:$8 sps:$4 sm:$0xff]  }
 0x287   :  { %3074 = vmatprep.subr.bf16.mxu0 %v4511_v30  ;;  %v4548_v30 = vld [vmem:[#allocation8 + $0x1c0] ss:$8 sps:$4 sm:$0xff]  }
 0x28a   :  { %3075 = vmatpush1.bf16.msra.mxu0 %v4509_v31  ;;  %v4553_v31 = vld [vmem:[#allocation8 + $0x1d4] ss:$8 sps:$4 sm:$0xff]  }
 0x28b   :  { %3085 = vmatprep.subr.bf16.mxu0 %v4514_v32  ;;  %v4551_v32 = vld [vmem:[#allocation8 + $0x1d0] ss:$8 sps:$4 sm:$0xff]  }
 0x320   :  { %v2551_v42 = vpop.f32.mrb[4].mxu0  ;;  %v4972_v51 = vpop.f32.mrb[8].mxu1 }
 0x321   :  { %v3917_v52 = vadd.f32 %v2551_v42, %v1819_v48  ;;  %v2553_v54 = vpop.f32.mrb[5].mxu0  ;;  %v2635_v55 = vpop.f32.mrb[9].mxu1  ;;  %v3919_v35 = vadd.f32 %v4972_v51, %v1827_v33  ;;  %v2721_v48 = vrot.slane %v2712_v46, %v4941_v29  ;;  %v4579_v29 = vld [vmem:[#allocation11 + $0x18] sm:$0xff]  }
 0x322   :  { %v3918_v56 = vadd.f32 %v2553_v54, %v1823_v40  ;;  %v3920_v57 = vadd.f32 %v2635_v55, %v1831_v50  ;;  %v2555_v58 = vpop.f32.mrb[6].mxu0  ;;  %v2637_v59 = vpop.f32.mrb[10].mxu1 }
 0x323   :  { %v2640_v28 = vmax.f32 %v3917_v52, 0.0  ;;  %v2556_v60 = vpop.f32.mrb[7].mxu0  ;;  %v2638_v61 = vpop.f32.mrb[11].mxu1  ;;  %v2642_v38 = vmax.f32 %v3919_v35, 0.0  ;;  %v4576_v58 = vld [vmem:[#allocation11] sm:$0xff]  }
 0x324   :  { %v2641_v62 = vmax.f32 %v3918_v56, 0.0  ;;  %v2643_v53 = vmax.f32 %v3920_v57, 0.0  ;;  %v4580_v60 = vld [vmem:[#allocation11 + $0x20] sm:$0xff]   ;;  %v4581_v61 = vld [vmem:[#allocation11 + $0x28] sm:$0xff]  }
 0x325   :  { %v2644_v2 = vpack.c.bf16 %v2640_v28, %v2640_v28  ;;  %v2646_v39 = vpack.c.bf16 %v2642_v38, %v2642_v38  ;;  %v4577_v28 = vld [vmem:[#allocation11 + $0x8] sm:$0xff]  }
 0x326   :  { %v2645_v63 = vpack.c.bf16 %v2641_v62, %v2641_v62  ;;  %v2647_v49 = vpack.c.bf16 %v2643_v53, %v2643_v53  ;;  %v4582_v62 = vld [vmem:[#allocation11 + $0x30] sm:$0xff]   ;;  %v4583_v53 = vld [vmem:[#allocation11 + $0x38] sm:$0xff]  }
 0x328   :  { %3076 = vmatprep.mubr.bf16.mxu0 %v2645_v63 }
 0x329   :  { %3077 = vmatmul.mubr.bf16.vlgmr.msra.gmra.mrb[8].mxu0 %v2644_v2 }
 0x32a   :  { %3086 = vmatpush1.bf16.msra.mxu0 %v4512_v1  ;;  %3117 = vmatprep.mubr.bf16.mxu0 %v2647_v49  ;;  %v3834_v1 = vld [vmem:[%s5009_s8] ss:$0 sm:$0xff]  ;;  %s4717_s8 = scalar_lea.vmem %s3426_s22, 128 }
 0x32b   :  { %3087 = vmatprep.subr.bf16.mxu0 %v4517_v3  ;;  %p4718_p6 = scmp.ne.s32.totalorder %s3426_s22, %s4717_s8  ;;  %p4723_p8 = scmp.lt.s32.totalorder %s4717_s8, %s4717_s8 }
 0x32d   :  { %p4724_p9 = por %p4723_p8, %p4722_p7 }
 0x32e   :  { %3088 = vmatpush1.bf16.msra.mxu0 %v4515_v4 }
 0x32f   :  { %3089 = vmatprep.subr.bf16.mxu0 %v4520_v5  ;;  %p4725_p10 = pnand %p4724_p9, %p4718_p6 }
 0x332   :  { %3090 = vmatpush1.bf16.msra.mxu0 %v4518_v6 }
 0x333   :  { %3091 = vmatprep.subr.bf16.mxu0 %v4523_v7 }
 0x336   :  { %3092 = vmatpush1.bf16.msra.mxu0 %v4521_v8  ;;  %v3851_v8 = vld [vmem:[%s5011_s10] ss:$0 sm:$0xff] }
 0x337   :  { %3093 = vmatprep.subr.bf16.mxu0 %v4526_v9 }
 0x33a   :  { %3094 = vmatpush1.bf16.msra.mxu0 %v4524_v10 }
 0x33b   :  { %3095 = vmatprep.subr.bf16.mxu0 %v4529_v11 }
 0x33e   :  { %3096 = vmatpush1.bf16.msra.mxu0 %v4527_v12 }
 0x33f   :  { %3097 = vmatprep.subr.bf16.mxu0 %v4532_v13 }
 0x342   :  { %3098 = vmatpush1.bf16.msra.mxu0 %v4530_v14 }
 0x343   :  { %3099 = vmatprep.subr.bf16.mxu0 %v4535_v15 }
 0x346   :  { %3100 = vmatpush1.bf16.msra.mxu0 %v4533_v17 }
 0x347   :  { %3101 = vmatprep.subr.bf16.mxu0 %v4538_v18 }
 0x34a   :  { %3102 = vmatpush1.bf16.msra.mxu0 %v4536_v19 }
 0x34b   :  { %3103 = vmatprep.subr.bf16.mxu0 %v4541_v20 }
 0x34e   :  { %3104 = vmatpush1.bf16.msra.mxu0 %v4539_v21 }
 0x34f   :  { %3105 = vmatprep.subr.bf16.mxu0 %v4544_v22 }
 0x352   :  { %3106 = vmatpush1.bf16.msra.mxu0 %v4542_v23 }
 0x353   :  { %3107 = vmatprep.subr.bf16.mxu0 %v4547_v24 }
 0x356   :  { %3108 = vmatpush1.bf16.msra.mxu0 %v4545_v25 }
 0x357   :  { %3109 = vmatprep.subr.bf16.mxu0 %v4550_v16 }
 0x35a   :  { %3110 = vmatpush1.bf16.msra.mxu0 %v4548_v30 }
 0x35b   :  { %3111 = vmatprep.subr.bf16.mxu0 %v4553_v31 }
 0x35e   :  { %3112 = vmatpush1.bf16.msra.mxu0 %v4551_v32 }
 0x35f   :  { %3113 = vmatprep.subr.bf16.mxu0 %v4556_v34 }
 0x362   :  { %3114 = vmatpush1.bf16.msra.mxu0 %v4554_v0 }
 0x363   :  { %3115 = vmatprep.subr.bf16.mxu0 %v4559_v36 }
 0x366   :  { %3116 = vmatpush1.bf16.msra.mxu0 %v4557_v37 }
 0x369   :  { %3118 = vmatmul.mubr.bf16.vlgmr.msra.gmra.mrb[8].mxu0 %v2646_v39 }
 0x43c   :  { %v3119_v40 = vpop.f32.mrb[8].mxu0 }
 0x43d   :  { %v3921_v50 = vadd.f32 %v3119_v40, %v2717_v47  ;;  %v3121_v42 = vpop.f32.mrb[9].mxu0 }
 0x43e   :  { %v3922_v51 = vadd.f32 %v3121_v42, %v2721_v48  ;;  %v3123_v52 = vpop.f32.mrb[10].mxu0 }
 0x43f   :  { %v3126_v54 = vmax.f32 %v3921_v50, 0.0  ;;  %v3124_v55 = vpop.f32.mrb[11].mxu0 }
 0x440   :  { %v3127_v56 = vmax.f32 %v3922_v51, 0.0 }
 0x441   :  { %v3128_v59 = vpack.c.bf16 %v3126_v54, %v3126_v54 }
 0x442   :  { %v3129_v57 = vpack.c.bf16 %v3127_v56, %v3127_v56 }
 0x444   :  { %3297 = vmatprep.mubr.bf16.mxu1 %v3129_v57 }
 0x445   :  { %3298 = vmatmul.mubr.bf16.vlgmr.msra.gmra.mrb[12].mxu1 %v3128_v59 }
 0x446   :  { %3892 = vmatpush3.bf16.msra.mxu1 %v4576_v58  ;;  %3907 = vmatprep.mubr.msk.bf16.mxu1 %vm4763_vm1, %v4762_v45 }
 0x447   :  { %3893 = vmatprep.subr.bf16.mxu1 %v4762_v45 }
 0x44a   :  { %3894 = vmatpush3.bf16.msra.mxu1 %v4577_v28 }
 0x44b   :  { %3895 = vmatprep.subr.bf16.mxu1 %v4762_v45 }
 0x44e   :  { %3896 = vmatpush3.bf16.msra.mxu1 %v4578_v27 }
 0x44f   :  { %3897 = vmatprep.subr.bf16.mxu1 %v4762_v45 }
 0x452   :  { %3898 = vmatpush3.bf16.msra.mxu1 %v4579_v29 }
 0x453   :  { %3899 = vmatprep.subr.bf16.mxu1 %v4762_v45 }
 0x456   :  { %3900 = vmatpush3.bf16.msra.mxu1 %v4580_v60 }
 0x457   :  { %3901 = vmatprep.subr.bf16.mxu1 %v4762_v45 }
 0x45a   :  { %3902 = vmatpush3.bf16.msra.mxu1 %v4581_v61 }
 0x45b   :  { %3903 = vmatprep.subr.bf16.mxu1 %v4762_v45 }
 0x45e   :  { %3904 = vmatpush3.bf16.msra.mxu1 %v4582_v62 }
 0x45f   :  { %3905 = vmatprep.subr.bf16.mxu1 %v4762_v45 }
 0x462   :  { %3906 = vmatpush3.bf16.msra.mxu1 %v4583_v53 }
 0x518   :  { %v3876_v63 = vpop.f32.mrb[12].mxu1 }
 0x519   :  { %v3877_v2 = vpop.f32.mrb[13].mxu1 }
 0x51a   :  { %v3878_v3 = vadd.f32 %v3877_v2, %v3876_v63  ;;  %v3879_v49 = vpop.f32.mrb[14].mxu1 }
 0x51b   :  { %v3880_v4 = vpop.f32.mrb[15].mxu1 }
 0x51c   :  { %v3300_v5 = vadd.f32 %v3878_v3, %v3834_v1 }
 0x51e   :  { %v3305_v6 = vmax.f32 %v3300_v5, 0.0 }
 0x520   :  { %v3306_v7 = vpack.c.bf16 %v3305_v6, %v3305_v6 }
 0x522   :  { %3908 = vmatmul.mubr.bf16.vlgmr.msra.gmra.mrb[16].mxu1 %v3306_v7 }
 0x5f5   :  { %v3412_v9 = vpop.f32.mrb[16].mxu1 }
 0x5f6   :  { %v3413_v10 = vadd.f32 %v3851_v8, %v3412_v9  ;;  %v3909_v11 = vpop.f32.mrb[17].mxu1 }
 0x5f7   :  { %v3415_v12 = vpop.f32.mrb[18].mxu1 }
 0x5f8   :  { %3418 = vst [vmem:[#allocation13] sm:$0xff] %v3413_v10  ;;  %v3910_v13 = vpop.f32.mrb[19].mxu1 }
 0x5f9   :  { %4728 = shalt.err (!%p4725_p10)
}
 0x5fa   :  { %s4729_s10 = scalar_lea.hbm %s5012_s11, 128 }
 0x5fb   :  { %p4730_p11 = scmp.ne.s32.totalorder %s5012_s11, %s4729_s10  ;;  %p4733_p12 = scmp.lt.u32.totalorder %s4729_s10, %s5012_s11 }
 0x5fd   :  { %p4735_p13 = pnand %p4733_p12, %p4730_p11 }
 0x5ff   :  { %4738 = shalt.err (!%p4735_p13)
}
 0x600   :  { %3428 = dma.vmem_to_hbm [thread:$0]  %s3426_s22, 128, %s5012_s11, [#allocation4]  }
 0x601   :  { %4747 = dma.done.wait [#allocation4], 128  }
 0x602   :  { %4748 = vsyncadd [#allocation4], 4294967168 }
 0x603   :  { %3432 = vsyncpa [#allocation3], 1 }
 0x604   :  { %3433 = vsyncpa [#allocation6], 1 }
 0x605   :  { %3434 = vsyncpa [#allocation9], 1 }
 0x606   :  { %3435 = vsyncpa [#allocation12], 1 }
 0x607   :  { %3436 = vsyncpa [#allocation4], 1 }

</bundles_post_ra>
